<compile_context>
chip_gen: v6e
topology: v6e:2x2x1
jax: 0.10.0
libtpu: 0.0.40
codegen_flags: <defaults>
</compile_context>

<pallas_src>
import jax
import jax.numpy as jnp
from jax import lax
from jax.experimental import pallas as pl
from jax.experimental.pallas import tpu as pltpu

# ---------------- configuration (mirrors CST_Module.__init__) ----------------
NUM_CLASSES = 2
TRADE_OFF = (0.08, 2.0, 0.5)
THRESHOLD = 0.97
TEMPERATURE = 3.0
ALPHA = 1.9
EPS_ENTROPY = 1e-5          # matches entropy() in the reference
EPS_NORM = 1e-12            # row-norm epsilon (F.normalize-style)
EPS_LOG = 1e-12             # epsilon inside log for p**alpha
CLAMP = 0.99999999
NEG_INF = -1e30

# stand-in "CST_Net" backbone dimensions (small shapes; reference views to 3x128x128)
IMG_C, IMG_H, IMG_W = 3, 16, 16
D_IN = IMG_C * IMG_H * IMG_W      # 768
F_DIM = 128                       # backbone feature dimension (lane-dense)
Y_PAD = 128                       # classifier head padded to a lane-dense width


# ---------------------------- pallas plumbing --------------------------------
def _full_spec(shape):
    zeros = (0,) * len(shape)
    return pl.BlockSpec(shape, lambda i, z=zeros: z)


def _pallas_full(kernel, inputs, out_shapes):
    """Run `kernel` once (grid=(1,)) with whole-array blocks resident in VMEM."""
    return pl.pallas_call(
        kernel,
        grid=(1,),
        in_specs=[_full_spec(x.shape) for x in inputs],
        out_specs=jax.tree.map(lambda s: _full_spec(s.shape), out_shapes),
        out_shape=out_shapes,
        compiler_params=pltpu.CompilerParams(dimension_semantics=("arbitrary",)),
    )(*inputs)


def _col_iota(shape):
    return lax.broadcasted_iota(jnp.int32, shape, 1)


# ------------------------------- kernels --------------------------------------
def _train_kernel(xs_ref, xtw_ref, xts_ref, w1_ref, b1_ref, w2_ref, b2_ref,
                  srcoh_ref, loss_ref):
    """Fully fused training branch.

    xs/xtw/xts : (N, D_IN) bf16 flattened source / target-weak / target-strong images
    srcoh_ref  : (N, 128) padded one-hot source labels (cols >= NUM_CLASSES zero)
    loss_ref   : (8, 128) lane-dense slab; every element holds the scalar loss.
    """
    ns = xs_ref.shape[0]
    nt = xtw_ref.shape[0]
    c = NUM_CLASSES
    cf = float(c)

    w1 = w1_ref[...]
    b1 = b1_ref[...]
    w2 = w2_ref[...]
    b2 = b2_ref[...]

    def backbone(x):                 # bf16 x bf16 on the MXU, f32 accumulation
        f = jnp.dot(x, w1, preferred_element_type=jnp.float32) + b1
        y = jnp.dot(f, w2, preferred_element_type=jnp.float32) + b2   # padded 128-wide
        return f, y

    f_s, y_s = backbone(xs_ref[...])
    f_t, y_t = backbone(xtw_ref[...])
    _, y_tu = backbone(xts_ref[...])

    def class_mask(shape):
        return _col_iota(shape) < c

    def mask_logits(y):              # -inf in the padded class columns
        return jnp.where(class_mask(y.shape), y, NEG_INF)

    def logsumexp(y_masked):         # (rows, 128) -> (rows, 1)
        m = jnp.max(y_masked, axis=-1, keepdims=True)
        return m + jnp.log(jnp.sum(jnp.exp(y_masked - m), axis=-1, keepdims=True))

    # ---- pseudo labels: softmax(y_t), max prob, one-hot of (first) argmax --------
    y_t_m = mask_logits(y_t)
    m_t = jnp.max(y_t_m, axis=-1, keepdims=True)
    e_t = jnp.exp(y_t_m - m_t)
    p_t = e_t / jnp.sum(e_t, axis=-1, keepdims=True)          # padded cols exactly 0
    maxp = jnp.max(p_t, axis=-1, keepdims=True)
    col_t = _col_iota(p_t.shape)
    cand = jnp.where(p_t == maxp, col_t, Y_PAD)
    idx = jnp.min(cand, axis=-1, keepdims=True)
    pred_oh = (col_t == idx).astype(jnp.float32)               # (nt, 128) padded one-hot

    # ---- Lu = mean( CE(y_t_u, pred_u) * [max_prob >= threshold] ) ----------------
    ce_u = logsumexp(mask_logits(y_tu)) - jnp.sum(pred_oh * y_tu, axis=-1, keepdims=True)
    keep = (maxp >= THRESHOLD).astype(jnp.float32)
    lu = jnp.sum(ce_u * keep, axis=0, keepdims=True) / nt                       # (1,1)

    # ---- source classification cross-entropy -------------------------------------
    src_oh = srcoh_ref[...]                                                     # (ns,128)
    ce_s = logsumexp(mask_logits(y_s)) - jnp.sum(src_oh * y_s, axis=-1, keepdims=True)
    cls_loss = jnp.sum(ce_s, axis=0, keepdims=True) / ns                        # (1,1)

    # ---- normalized grams ---------------------------------------------------------
    def rownorm(v):                  # v / ||v||  via rsqrt (EUP) + eps
        return v * lax.rsqrt(jnp.sum(v * v, axis=-1, keepdims=True) + EPS_NORM)

    f_s_n = rownorm(f_s)
    f_t_n = rownorm(f_t)
    target_k = lax.dot_general(f_t_n, f_t_n, (((1,), (1,)), ((), ())),
                               preferred_element_type=jnp.float32)              # (nt,nt)
    test_k = lax.dot_general(f_s_n, f_t_n, (((1,), (1,)), ((), ())),
                             preferred_element_type=jnp.float32)                # (ns,nt)
    target_k = jnp.clip(target_k, -CLAMP, CLAMP)
    test_k = jnp.clip(test_k, -CLAMP, CLAMP)
    row_t = lax.broadcasted_iota(jnp.int32, (nt, nt), 0)
    col_tk = lax.broadcasted_iota(jnp.int32, (nt, nt), 1)
    eye = (row_t == col_tk).astype(jnp.float32)
    sum_kernel = target_k + 1e-3 * eye                                          # SPD

    # ---- in-kernel SPD solve (unpivoted Gauss-Jordan), replaces torch.inverse -----
    # Solve sum_kernel @ X = labels_c (lane-dense padded RHS; padded cols stay zero).
    labels_c = jnp.where(class_mask(pred_oh.shape), pred_oh - 1.0 / cf, 0.0)    # (nt,128)
    a = sum_kernel
    bmat = labels_c
    rows = lax.broadcasted_iota(jnp.int32, (nt, 1), 0)
    for k in range(nt):              # static unroll (nt == 8); SPD => pivots > 0
        pa = a[k:k + 1, :]                                   # (1, nt)
        pb = bmat[k:k + 1, :]                                # (1, 128)
        inv_p = 1.0 / pa[:, k:k + 1]                         # (1, 1)
        pa = pa * inv_p
        pb = pb * inv_p
        fac = a[:, k:k + 1]                                  # (nt, 1)
        is_k = (rows == k).astype(jnp.float32)
        a = a - fac * pa + is_k * pa
        bmat = bmat - fac * pb + is_k * pb
    # bmat == inv(sum_kernel) @ labels_c

    test_pred = jnp.dot(test_k, bmat, preferred_element_type=jnp.float32)       # (ns,128)
    src_c = jnp.where(class_mask(src_oh.shape), src_oh - 1.0 / cf, 0.0)
    diff = test_pred - src_c                                  # padded cols are 0 - 0
    reverse_loss = jnp.sum(jnp.sum(diff * diff, axis=-1, keepdims=True),
                           axis=0, keepdims=True) / (ns * cf)                   # (1,1)

    # ---- Tsallis entropy transfer loss on target logits ---------------------------
    logits = mask_logits(y_t) / TEMPERATURE
    m = jnp.max(logits, axis=-1, keepdims=True)
    e = jnp.exp(logits - m)
    p = e / jnp.sum(e, axis=-1, keepdims=True)                # (nt,128), padded cols 0
    h = -jnp.sum(p * jnp.log(p + EPS_ENTROPY), axis=-1, keepdims=True)           # (nt,1)
    ew = 1.0 + jnp.exp(-h)
    ew = nt * ew / jnp.sum(ew, axis=0, keepdims=True)                            # (nt,1)
    sum_dim = jnp.sum(p * ew, axis=0, keepdims=True)                             # (1,128)
    mean_sd = jnp.sum(sum_dim, axis=-1, keepdims=True) / cf                      # (1,1)
    p_alpha = jnp.exp(ALPHA * jnp.log(p + EPS_LOG))                              # p**alpha
    sum_dim_safe = jnp.where(class_mask(sum_dim.shape), sum_dim, 1.0)
    term = jnp.where(class_mask(p.shape), p_alpha / sum_dim_safe * ew, 0.0)
    per_row = jnp.sum(term, axis=-1, keepdims=True)                              # (nt,1)
    transfer = (1.0 / (ALPHA - 1.0)) * jnp.sum(1.0 / mean_sd - per_row,
                                               axis=0, keepdims=True)            # (1,1)

    base = cls_loss + transfer * TRADE_OFF[0] + reverse_loss * TRADE_OFF[1]
    total = jnp.where(lu != 0.0, base + lu * TRADE_OFF[2], base)   # matches `if Lu != 0`
    loss_ref[...] = jnp.broadcast_to(total, loss_ref.shape)        # lane-dense slab


def _infer_kernel(x_ref, w1_ref, b1_ref, w2_ref, b2_ref, o_ref):
    """Auto-labelling branch: fused backbone + softmax; lanes [0:C] hold the probs."""
    f = jnp.dot(x_ref[...], w1_ref[...],
                preferred_element_type=jnp.float32) + b1_ref[...]
    y = jnp.dot(f, w2_ref[...], preferred_element_type=jnp.float32) + b2_ref[...]
    col = _col_iota(y.shape)
    y_m = jnp.where(col < NUM_CLASSES, y, NEG_INF)      # mask padded head columns
    m = jnp.max(y_m, axis=-1, keepdims=True)
    e = jnp.exp(y_m - m)
    o_ref[...] = e / jnp.sum(e, axis=-1, keepdims=True)


# ------------------------------ model glue ------------------------------------
def init_params(key):
    # TODO(synk): the reference CST_Net wraps an external resnet50 that is not defined
    # in the provided source; replaced with a deterministic 2-layer dense stand-in.
    k1, k2, k3, k4 = jax.random.split(key, 4)
    w1 = 0.02 * jax.random.normal(k1, (D_IN, F_DIM), jnp.float32)
    b1 = 0.01 * jax.random.normal(k2, (1, F_DIM), jnp.float32)
    w2 = 0.02 * jax.random.normal(k3, (F_DIM, NUM_CLASSES), jnp.float32)
    b2 = 0.01 * jax.random.normal(k4, (1, NUM_CLASSES), jnp.float32)
    # zero-pad the 2-class head to a lane-dense 128-wide output
    w2p = jnp.zeros((F_DIM, Y_PAD), jnp.float32).at[:, :NUM_CLASSES].set(w2)
    b2p = jnp.zeros((1, Y_PAD), jnp.float32).at[:, :NUM_CLASSES].set(b2)
    return {"w1": w1.astype(jnp.bfloat16), "b1": b1, "w2p": w2p, "b2p": b2p}


def cst_module_forward(params, x_source, source_cls_labels, t_weak, t_strong):
    """Training branch (uda_auto_labelling == False). Returns scalar loss."""
    ns = x_source.shape[0]
    nt = t_weak.shape[0]
    assert ns == nt == t_strong.shape[0]

    # three separate bf16 inputs (no host-side concatenate / extra HBM round-trip)
    xs = x_source.reshape(ns, -1).astype(jnp.bfloat16)
    xtw = t_weak.reshape(nt, -1).astype(jnp.bfloat16)
    xts = t_strong.reshape(nt, -1).astype(jnp.bfloat16)
    # padded one-hot labels (labels < NUM_CLASSES, so cols >= NUM_CLASSES are zero)
    src_oh = jax.nn.one_hot(source_cls_labels, Y_PAD, dtype=jnp.float32)

    loss_slab = _pallas_full(
        _train_kernel,
        [xs, xtw, xts, params["w1"], params["b1"], params["w2p"], params["b2p"], src_oh],
        jax.ShapeDtypeStruct((8, Y_PAD), jnp.float32))
    return loss_slab[0, 0]


def cst_module_forward_auto_label(params, x_source):
    """Inference branch (uda_auto_labelling == True). Returns (cls_out, softmax probs)."""
    n = x_source.shape[0]
    x_flat = x_source.reshape(n, -1).astype(jnp.bfloat16)
    slab = _pallas_full(
        _infer_kernel,
        [x_flat, params["w1"], params["b1"], params["w2p"], params["b2p"]],
        jax.ShapeDtypeStruct((n, Y_PAD), jnp.float32))
    probs = slab[:, :NUM_CLASSES]
    cls_out = jnp.argmax(probs, axis=-1)
    return cls_out, probs


# --------------------------------- main ----------------------------------------
if __name__ == "__main__":
    key = jax.random.PRNGKey(0)
    kp, ks, kw, kst, kl = jax.random.split(key, 5)
    params = init_params(kp)

    N = 8  # per-domain batch (source batch must equal target batch for chunk(2))
    x_source = jax.random.normal(ks, (N, IMG_C, IMG_H, IMG_W), jnp.float32)
    t_weak = jax.random.normal(kw, (N, IMG_C, IMG_H, IMG_W), jnp.float32)
    t_strong = jax.random.normal(kst, (N, IMG_C, IMG_H, IMG_W), jnp.float32)
    source_cls_labels = jax.random.randint(kl, (N,), 0, NUM_CLASSES, jnp.int32)

    loss = jax.jit(cst_module_forward)(params, x_source, source_cls_labels,
                                       t_weak, t_strong)
    jax.block_until_ready(loss)
    assert jnp.isfinite(loss)

    cls_out, cls_probs = jax.jit(cst_module_forward_auto_label)(params, x_source)
    jax.block_until_ready((cls_out, cls_probs))
    assert cls_out.shape == (N,) and cls_probs.shape == (N, NUM_CLASSES)
    assert bool(jnp.all(jnp.isfinite(cls_probs)))

    print("KERNEL_OK")
</pallas_src>

<mosaic_0001>
module attributes {stable_mosaic.version = 11 : i64} {
  func.func @_train_kernel(%arg0: i32, %arg1: memref<8x768xbf16, #tpu.memory_space<vmem>>, %arg2: memref<8x768xbf16, #tpu.memory_space<vmem>>, %arg3: memref<8x768xbf16, #tpu.memory_space<vmem>>, %arg4: memref<768x128xbf16, #tpu.memory_space<vmem>>, %arg5: memref<1x128xf32, #tpu.memory_space<vmem>>, %arg6: memref<128x128xf32, #tpu.memory_space<vmem>>, %arg7: memref<1x128xf32, #tpu.memory_space<vmem>>, %arg8: memref<8x128xf32, #tpu.memory_space<vmem>>, %arg9: memref<8x128xf32, #tpu.memory_space<vmem>>) attributes {dimension_semantics = [#tpu.dimension_semantics<arbitrary>], iteration_bounds = array<i64: 1>, scalar_prefetch = 0 : i64, scratch_operands = 0 : i64, tpu.core_type = #tpu.core_type<tc>, window_params = [{pipeline_mode = #tpu.pipeline_mode<synchronous>, transform_indices = @transform_0, window_bounds = array<i64: 8, 768>}, {pipeline_mode = #tpu.pipeline_mode<synchronous>, transform_indices = @transform_1, window_bounds = array<i64: 8, 768>}, {pipeline_mode = #tpu.pipeline_mode<synchronous>, transform_indices = @transform_2, window_bounds = array<i64: 8, 768>}, {pipeline_mode = #tpu.pipeline_mode<synchronous>, transform_indices = @transform_3, window_bounds = array<i64: 768, 128>}, {pipeline_mode = #tpu.pipeline_mode<synchronous>, transform_indices = @transform_4, window_bounds = array<i64: 1, 128>}, {pipeline_mode = #tpu.pipeline_mode<synchronous>, transform_indices = @transform_5, window_bounds = array<i64: 128, 128>}, {pipeline_mode = #tpu.pipeline_mode<synchronous>, transform_indices = @transform_6, window_bounds = array<i64: 1, 128>}, {pipeline_mode = #tpu.pipeline_mode<synchronous>, transform_indices = @transform_7, window_bounds = array<i64: 8, 128>}, {pipeline_mode = #tpu.pipeline_mode<synchronous>, transform_indices = @transform_8, window_bounds = array<i64: 8, 128>}]} {
    %c0 = arith.constant 0 : index
    %c0_0 = arith.constant 0 : index
    %0 = vector.load %arg4[%c0, %c0_0] : memref<768x128xbf16, #tpu.memory_space<vmem>>, vector<768x128xbf16>
    %c0_1 = arith.constant 0 : index
    %c0_2 = arith.constant 0 : index
    %1 = vector.load %arg5[%c0_1, %c0_2] : memref<1x128xf32, #tpu.memory_space<vmem>>, vector<1x128xf32>
    %c0_3 = arith.constant 0 : index
    %c0_4 = arith.constant 0 : index
    %2 = vector.load %arg6[%c0_3, %c0_4] : memref<128x128xf32, #tpu.memory_space<vmem>>, vector<128x128xf32>
    %c0_5 = arith.constant 0 : index
    %c0_6 = arith.constant 0 : index
    %3 = vector.load %arg7[%c0_5, %c0_6] : memref<1x128xf32, #tpu.memory_space<vmem>>, vector<1x128xf32>
    %c0_7 = arith.constant 0 : index
    %c0_8 = arith.constant 0 : index
    %4 = vector.load %arg1[%c0_7, %c0_8] : memref<8x768xbf16, #tpu.memory_space<vmem>>, vector<8x768xbf16>
    %cst = arith.constant dense<0.000000e+00> : vector<8x128xf32>
    %5 = tpu.matmul %4, %0, %cst {dimension_numbers = #tpu.dot_dimension_numbers<[1], [0], [0], [1], [0, 0, 1, 1], [], []>} : vector<8x768xbf16>, vector<768x128xbf16>, vector<8x128xf32> -> vector<8x128xf32>
    %6 = vector.broadcast %1 : vector<1x128xf32> to vector<8x128xf32>
    %7 = arith.addf %5, %6 : vector<8x128xf32>
    %cst_9 = arith.constant dense<0.000000e+00> : vector<8x128xf32>
    %8 = tpu.matmul %7, %2, %cst_9 {dimension_numbers = #tpu.dot_dimension_numbers<[1], [0], [0], [1], [0, 0, 1, 1], [], []>} : vector<8x128xf32>, vector<128x128xf32>, vector<8x128xf32> -> vector<8x128xf32>
    %9 = vector.broadcast %3 : vector<1x128xf32> to vector<8x128xf32>
    %10 = arith.addf %8, %9 : vector<8x128xf32>
    %c0_10 = arith.constant 0 : index
    %c0_11 = arith.constant 0 : index
    %11 = vector.load %arg2[%c0_10, %c0_11] : memref<8x768xbf16, #tpu.memory_space<vmem>>, vector<8x768xbf16>
    %cst_12 = arith.constant dense<0.000000e+00> : vector<8x128xf32>
    %12 = tpu.matmul %11, %0, %cst_12 {dimension_numbers = #tpu.dot_dimension_numbers<[1], [0], [0], [1], [0, 0, 1, 1], [], []>} : vector<8x768xbf16>, vector<768x128xbf16>, vector<8x128xf32> -> vector<8x128xf32>
    %13 = vector.broadcast %1 : vector<1x128xf32> to vector<8x128xf32>
    %14 = arith.addf %12, %13 : vector<8x128xf32>
    %cst_13 = arith.constant dense<0.000000e+00> : vector<8x128xf32>
    %15 = tpu.matmul %14, %2, %cst_13 {dimension_numbers = #tpu.dot_dimension_numbers<[1], [0], [0], [1], [0, 0, 1, 1], [], []>} : vector<8x128xf32>, vector<128x128xf32>, vector<8x128xf32> -> vector<8x128xf32>
    %16 = vector.broadcast %3 : vector<1x128xf32> to vector<8x128xf32>
    %17 = arith.addf %15, %16 : vector<8x128xf32>
    %c0_14 = arith.constant 0 : index
    %c0_15 = arith.constant 0 : index
    %18 = vector.load %arg3[%c0_14, %c0_15] : memref<8x768xbf16, #tpu.memory_space<vmem>>, vector<8x768xbf16>
    %cst_16 = arith.constant dense<0.000000e+00> : vector<8x128xf32>
    %19 = tpu.matmul %18, %0, %cst_16 {dimension_numbers = #tpu.dot_dimension_numbers<[1], [0], [0], [1], [0, 0, 1, 1], [], []>} : vector<8x768xbf16>, vector<768x128xbf16>, vector<8x128xf32> -> vector<8x128xf32>
    %20 = vector.broadcast %1 : vector<1x128xf32> to vector<8x128xf32>
    %21 = arith.addf %19, %20 : vector<8x128xf32>
    %cst_17 = arith.constant dense<0.000000e+00> : vector<8x128xf32>
    %22 = tpu.matmul %21, %2, %cst_17 {dimension_numbers = #tpu.dot_dimension_numbers<[1], [0], [0], [1], [0, 0, 1, 1], [], []>} : vector<8x128xf32>, vector<128x128xf32>, vector<8x128xf32> -> vector<8x128xf32>
    %23 = vector.broadcast %3 : vector<1x128xf32> to vector<8x128xf32>
    %24 = arith.addf %22, %23 : vector<8x128xf32>
    %25 = tpu.iota {dimensions = array<i32: 1>} : vector<8x128xi32>
    %c2_i32 = arith.constant 2 : i32
    %26 = vector.broadcast %c2_i32 : i32 to vector<8x128xi32>
    %27 = arith.cmpi slt, %25, %26 : vector<8x128xi32>
    %cst_18 = arith.constant -1.000000e+30 : f32
    %28 = vector.broadcast %cst_18 : f32 to vector<8x128xf32>
    %29 = arith.select %27, %17, %28 : vector<8x128xi1>, vector<8x128xf32>
    %cst_19 = arith.constant dense<0xFF800000> : vector<8xf32>
    %30 = vector.multi_reduction <maximumf>, %29, %cst_19 [1] : vector<8x128xf32> to vector<8xf32>
    %31 = vector.shape_cast %30 : vector<8xf32> to vector<8x1xf32>
    %32 = vector.broadcast %31 : vector<8x1xf32> to vector<8x128xf32>
    %33 = arith.subf %29, %32 : vector<8x128xf32>
    %34 = math.exp %33 : vector<8x128xf32>
    %cst_20 = arith.constant dense<0.000000e+00> : vector<8xf32>
    %35 = vector.multi_reduction <add>, %34, %cst_20 [1] : vector<8x128xf32> to vector<8xf32>
    %36 = vector.shape_cast %35 : vector<8xf32> to vector<8x1xf32>
    %37 = vector.broadcast %36 : vector<8x1xf32> to vector<8x128xf32>
    %38 = arith.divf %34, %37 : vector<8x128xf32>
    %cst_21 = arith.constant dense<0xFF800000> : vector<8xf32>
    %39 = vector.multi_reduction <maximumf>, %38, %cst_21 [1] : vector<8x128xf32> to vector<8xf32>
    %40 = vector.shape_cast %39 : vector<8xf32> to vector<8x1xf32>
    %41 = tpu.iota {dimensions = array<i32: 1>} : vector<8x128xi32>
    %42 = vector.broadcast %40 : vector<8x1xf32> to vector<8x128xf32>
    %43 = arith.cmpf oeq, %38, %42 : vector<8x128xf32>
    %c128_i32 = arith.constant 128 : i32
    %44 = vector.broadcast %c128_i32 : i32 to vector<8x128xi32>
    %45 = arith.select %43, %41, %44 : vector<8x128xi1>, vector<8x128xi32>
    %cst_22 = arith.constant dense<2147483647> : vector<8xi32>
    %46 = vector.multi_reduction <minsi>, %45, %cst_22 [1] : vector<8x128xi32> to vector<8xi32>
    %47 = vector.shape_cast %46 : vector<8xi32> to vector<8x1xi32>
    %48 = vector.broadcast %47 : vector<8x1xi32> to vector<8x128xi32>
    %49 = arith.cmpi eq, %41, %48 : vector<8x128xi32>
    %50 = arith.extui %49 : vector<8x128xi1> to vector<8x128xi32>
    %51 = arith.sitofp %50 : vector<8x128xi32> to vector<8x128xf32>
    %52 = tpu.iota {dimensions = array<i32: 1>} : vector<8x128xi32>
    %c2_i32_23 = arith.constant 2 : i32
    %53 = vector.broadcast %c2_i32_23 : i32 to vector<8x128xi32>
    %54 = arith.cmpi slt, %52, %53 : vector<8x128xi32>
    %cst_24 = arith.constant -1.000000e+30 : f32
    %55 = vector.broadcast %cst_24 : f32 to vector<8x128xf32>
    %56 = arith.select %54, %24, %55 : vector<8x128xi1>, vector<8x128xf32>
    %cst_25 = arith.constant dense<0xFF800000> : vector<8xf32>
    %57 = vector.multi_reduction <maximumf>, %56, %cst_25 [1] : vector<8x128xf32> to vector<8xf32>
    %58 = vector.shape_cast %57 : vector<8xf32> to vector<8x1xf32>
    %59 = vector.broadcast %58 : vector<8x1xf32> to vector<8x128xf32>
    %60 = arith.subf %56, %59 : vector<8x128xf32>
    %61 = math.exp %60 : vector<8x128xf32>
    %cst_26 = arith.constant dense<0.000000e+00> : vector<8xf32>
    %62 = vector.multi_reduction <add>, %61, %cst_26 [1] : vector<8x128xf32> to vector<8xf32>
    %63 = vector.shape_cast %62 : vector<8xf32> to vector<8x1xf32>
    %64 = math.log %63 : vector<8x1xf32>
    %65 = arith.addf %58, %64 : vector<8x1xf32>
    %66 = arith.mulf %51, %24 : vector<8x128xf32>
    %cst_27 = arith.constant dense<0.000000e+00> : vector<8xf32>
    %67 = vector.multi_reduction <add>, %66, %cst_27 [1] : vector<8x128xf32> to vector<8xf32>
    %68 = vector.shape_cast %67 : vector<8xf32> to vector<8x1xf32>
    %69 = arith.subf %65, %68 : vector<8x1xf32>
    %cst_28 = arith.constant 9.700000e-01 : f32
    %70 = vector.broadcast %cst_28 : f32 to vector<8x1xf32>
    %71 = arith.cmpf oge, %40, %70 : vector<8x1xf32>
    %72 = arith.extui %71 : vector<8x1xi1> to vector<8x1xi32>
    %73 = arith.sitofp %72 : vector<8x1xi32> to vector<8x1xf32>
    %74 = arith.mulf %69, %73 : vector<8x1xf32>
    %cst_29 = arith.constant dense<0.000000e+00> : vector<1xf32>
    %75 = vector.multi_reduction <add>, %74, %cst_29 [0] : vector<8x1xf32> to vector<1xf32>
    %76 = vector.shape_cast %75 : vector<1xf32> to vector<1x1xf32>
    %cst_30 = arith.constant 8.000000e+00 : f32
    %77 = vector.broadcast %cst_30 : f32 to vector<1x1xf32>
    %78 = arith.divf %76, %77 : vector<1x1xf32>
    %c0_31 = arith.constant 0 : index
    %c0_32 = arith.constant 0 : index
    %79 = vector.load %arg8[%c0_31, %c0_32] : memref<8x128xf32, #tpu.memory_space<vmem>>, vector<8x128xf32>
    %80 = tpu.iota {dimensions = array<i32: 1>} : vector<8x128xi32>
    %c2_i32_33 = arith.constant 2 : i32
    %81 = vector.broadcast %c2_i32_33 : i32 to vector<8x128xi32>
    %82 = arith.cmpi slt, %80, %81 : vector<8x128xi32>
    %cst_34 = arith.constant -1.000000e+30 : f32
    %83 = vector.broadcast %cst_34 : f32 to vector<8x128xf32>
    %84 = arith.select %82, %10, %83 : vector<8x128xi1>, vector<8x128xf32>
    %cst_35 = arith.constant dense<0xFF800000> : vector<8xf32>
    %85 = vector.multi_reduction <maximumf>, %84, %cst_35 [1] : vector<8x128xf32> to vector<8xf32>
    %86 = vector.shape_cast %85 : vector<8xf32> to vector<8x1xf32>
    %87 = vector.broadcast %86 : vector<8x1xf32> to vector<8x128xf32>
    %88 = arith.subf %84, %87 : vector<8x128xf32>
    %89 = math.exp %88 : vector<8x128xf32>
    %cst_36 = arith.constant dense<0.000000e+00> : vector<8xf32>
    %90 = vector.multi_reduction <add>, %89, %cst_36 [1] : vector<8x128xf32> to vector<8xf32>
    %91 = vector.shape_cast %90 : vector<8xf32> to vector<8x1xf32>
    %92 = math.log %91 : vector<8x1xf32>
    %93 = arith.addf %86, %92 : vector<8x1xf32>
    %94 = arith.mulf %79, %10 : vector<8x128xf32>
    %cst_37 = arith.constant dense<0.000000e+00> : vector<8xf32>
    %95 = vector.multi_reduction <add>, %94, %cst_37 [1] : vector<8x128xf32> to vector<8xf32>
    %96 = vector.shape_cast %95 : vector<8xf32> to vector<8x1xf32>
    %97 = arith.subf %93, %96 : vector<8x1xf32>
    %cst_38 = arith.constant dense<0.000000e+00> : vector<1xf32>
    %98 = vector.multi_reduction <add>, %97, %cst_38 [0] : vector<8x1xf32> to vector<1xf32>
    %99 = vector.shape_cast %98 : vector<1xf32> to vector<1x1xf32>
    %cst_39 = arith.constant 8.000000e+00 : f32
    %100 = vector.broadcast %cst_39 : f32 to vector<1x1xf32>
    %101 = arith.divf %99, %100 : vector<1x1xf32>
    %102 = arith.mulf %7, %7 : vector<8x128xf32>
    %cst_40 = arith.constant dense<0.000000e+00> : vector<8xf32>
    %103 = vector.multi_reduction <add>, %102, %cst_40 [1] : vector<8x128xf32> to vector<8xf32>
    %104 = vector.shape_cast %103 : vector<8xf32> to vector<8x1xf32>
    %cst_41 = arith.constant 9.99999996E-13 : f32
    %105 = vector.broadcast %cst_41 : f32 to vector<8x1xf32>
    %106 = arith.addf %104, %105 : vector<8x1xf32>
    %107 = math.rsqrt %106 : vector<8x1xf32>
    %108 = vector.broadcast %107 : vector<8x1xf32> to vector<8x128xf32>
    %109 = arith.mulf %7, %108 : vector<8x128xf32>
    %110 = arith.mulf %14, %14 : vector<8x128xf32>
    %cst_42 = arith.constant dense<0.000000e+00> : vector<8xf32>
    %111 = vector.multi_reduction <add>, %110, %cst_42 [1] : vector<8x128xf32> to vector<8xf32>
    %112 = vector.shape_cast %111 : vector<8xf32> to vector<8x1xf32>
    %cst_43 = arith.constant 9.99999996E-13 : f32
    %113 = vector.broadcast %cst_43 : f32 to vector<8x1xf32>
    %114 = arith.addf %112, %113 : vector<8x1xf32>
    %115 = math.rsqrt %114 : vector<8x1xf32>
    %116 = vector.broadcast %115 : vector<8x1xf32> to vector<8x128xf32>
    %117 = arith.mulf %14, %116 : vector<8x128xf32>
    %cst_44 = arith.constant dense<0.000000e+00> : vector<8x8xf32>
    %118 = tpu.matmul %117, %117, %cst_44 {dimension_numbers = #tpu.dot_dimension_numbers<[1], [1], [0], [0], [0, 0, 1, 0], [], []>} : vector<8x128xf32>, vector<8x128xf32>, vector<8x8xf32> -> vector<8x8xf32>
    %cst_45 = arith.constant dense<0.000000e+00> : vector<8x8xf32>
    %119 = tpu.matmul %109, %117, %cst_45 {dimension_numbers = #tpu.dot_dimension_numbers<[1], [1], [0], [0], [0, 0, 1, 0], [], []>} : vector<8x128xf32>, vector<8x128xf32>, vector<8x8xf32> -> vector<8x8xf32>
    %cst_46 = arith.constant -1.000000e+00 : f32
    %cst_47 = arith.constant 1.000000e+00 : f32
    %120 = vector.broadcast %cst_46 : f32 to vector<8x8xf32>
    %121 = arith.maximumf %120, %118 : vector<8x8xf32>
    %122 = vector.broadcast %cst_47 : f32 to vector<8x8xf32>
    %123 = arith.minimumf %122, %121 : vector<8x8xf32>
    %cst_48 = arith.constant -1.000000e+00 : f32
    %cst_49 = arith.constant 1.000000e+00 : f32
    %124 = vector.broadcast %cst_48 : f32 to vector<8x8xf32>
    %125 = arith.maximumf %124, %119 : vector<8x8xf32>
    %126 = vector.broadcast %cst_49 : f32 to vector<8x8xf32>
    %127 = arith.minimumf %126, %125 : vector<8x8xf32>
    %128 = tpu.iota {dimensions = array<i32: 0>} : vector<8x8xi32>
    %129 = tpu.iota {dimensions = array<i32: 1>} : vector<8x8xi32>
    %130 = arith.cmpi eq, %128, %129 : vector<8x8xi32>
    %131 = arith.extui %130 : vector<8x8xi1> to vector<8x8xi32>
    %132 = arith.sitofp %131 : vector<8x8xi32> to vector<8x8xf32>
    %cst_50 = arith.constant 1.000000e-03 : f32
    %133 = vector.broadcast %cst_50 : f32 to vector<8x8xf32>
    %134 = arith.mulf %133, %132 : vector<8x8xf32>
    %135 = arith.addf %123, %134 : vector<8x8xf32>
    %136 = tpu.iota {dimensions = array<i32: 1>} : vector<8x128xi32>
    %c2_i32_51 = arith.constant 2 : i32
    %137 = vector.broadcast %c2_i32_51 : i32 to vector<8x128xi32>
    %138 = arith.cmpi slt, %136, %137 : vector<8x128xi32>
    %cst_52 = arith.constant 5.000000e-01 : f32
    %139 = vector.broadcast %cst_52 : f32 to vector<8x128xf32>
    %140 = arith.subf %51, %139 : vector<8x128xf32>
    %cst_53 = arith.constant 0.000000e+00 : f32
    %141 = vector.broadcast %cst_53 : f32 to vector<8x128xf32>
    %142 = arith.select %138, %140, %141 : vector<8x128xi1>, vector<8x128xf32>
    %143 = tpu.iota {dimensions = array<i32: 0>} : vector<8x1xi32>
    %144 = vector.extract_strided_slice %135 {offsets = [0, 0], sizes = [1, 8], strides = [1, 1]} : vector<8x8xf32> to vector<1x8xf32>
    %145 = vector.extract_strided_slice %142 {offsets = [0, 0], sizes = [1, 128], strides = [1, 1]} : vector<8x128xf32> to vector<1x128xf32>
    %146 = vector.extract_strided_slice %144 {offsets = [0, 0], sizes = [1, 1], strides = [1, 1]} : vector<1x8xf32> to vector<1x1xf32>
    %cst_54 = arith.constant 1.000000e+00 : f32
    %147 = vector.broadcast %cst_54 : f32 to vector<1x1xf32>
    %148 = arith.divf %147, %146 : vector<1x1xf32>
    %149 = vector.broadcast %148 : vector<1x1xf32> to vector<1x8xf32>
    %150 = arith.mulf %144, %149 : vector<1x8xf32>
    %151 = vector.broadcast %148 : vector<1x1xf32> to vector<1x128xf32>
    %152 = arith.mulf %145, %151 : vector<1x128xf32>
    %153 = vector.extract_strided_slice %135 {offsets = [0, 0], sizes = [8, 1], strides = [1, 1]} : vector<8x8xf32> to vector<8x1xf32>
    %c0_i32 = arith.constant 0 : i32
    %154 = vector.broadcast %c0_i32 : i32 to vector<8x1xi32>
    %155 = arith.cmpi eq, %143, %154 : vector<8x1xi32>
    %156 = arith.extui %155 : vector<8x1xi1> to vector<8x1xi32>
    %157 = arith.sitofp %156 : vector<8x1xi32> to vector<8x1xf32>
    %158 = vector.broadcast %153 : vector<8x1xf32> to vector<8x8xf32>
    %159 = vector.broadcast %150 : vector<1x8xf32> to vector<8x8xf32>
    %160 = arith.mulf %158, %159 : vector<8x8xf32>
    %161 = arith.subf %135, %160 : vector<8x8xf32>
    %162 = vector.broadcast %157 : vector<8x1xf32> to vector<8x8xf32>
    %163 = vector.broadcast %150 : vector<1x8xf32> to vector<8x8xf32>
    %164 = arith.mulf %162, %163 : vector<8x8xf32>
    %165 = arith.addf %161, %164 : vector<8x8xf32>
    %166 = vector.broadcast %153 : vector<8x1xf32> to vector<8x128xf32>
    %167 = vector.broadcast %152 : vector<1x128xf32> to vector<8x128xf32>
    %168 = arith.mulf %166, %167 : vector<8x128xf32>
    %169 = arith.subf %142, %168 : vector<8x128xf32>
    %170 = vector.broadcast %157 : vector<8x1xf32> to vector<8x128xf32>
    %171 = vector.broadcast %152 : vector<1x128xf32> to vector<8x128xf32>
    %172 = arith.mulf %170, %171 : vector<8x128xf32>
    %173 = arith.addf %169, %172 : vector<8x128xf32>
    %174 = vector.extract_strided_slice %165 {offsets = [1, 0], sizes = [1, 8], strides = [1, 1]} : vector<8x8xf32> to vector<1x8xf32>
    %175 = vector.extract_strided_slice %173 {offsets = [1, 0], sizes = [1, 128], strides = [1, 1]} : vector<8x128xf32> to vector<1x128xf32>
    %176 = vector.extract_strided_slice %174 {offsets = [0, 1], sizes = [1, 1], strides = [1, 1]} : vector<1x8xf32> to vector<1x1xf32>
    %cst_55 = arith.constant 1.000000e+00 : f32
    %177 = vector.broadcast %cst_55 : f32 to vector<1x1xf32>
    %178 = arith.divf %177, %176 : vector<1x1xf32>
    %179 = vector.broadcast %178 : vector<1x1xf32> to vector<1x8xf32>
    %180 = arith.mulf %174, %179 : vector<1x8xf32>
    %181 = vector.broadcast %178 : vector<1x1xf32> to vector<1x128xf32>
    %182 = arith.mulf %175, %181 : vector<1x128xf32>
    %183 = vector.extract_strided_slice %165 {offsets = [0, 1], sizes = [8, 1], strides = [1, 1]} : vector<8x8xf32> to vector<8x1xf32>
    %c1_i32 = arith.constant 1 : i32
    %184 = vector.broadcast %c1_i32 : i32 to vector<8x1xi32>
    %185 = arith.cmpi eq, %143, %184 : vector<8x1xi32>
    %186 = arith.extui %185 : vector<8x1xi1> to vector<8x1xi32>
    %187 = arith.sitofp %186 : vector<8x1xi32> to vector<8x1xf32>
    %188 = vector.broadcast %183 : vector<8x1xf32> to vector<8x8xf32>
    %189 = vector.broadcast %180 : vector<1x8xf32> to vector<8x8xf32>
    %190 = arith.mulf %188, %189 : vector<8x8xf32>
    %191 = arith.subf %165, %190 : vector<8x8xf32>
    %192 = vector.broadcast %187 : vector<8x1xf32> to vector<8x8xf32>
    %193 = vector.broadcast %180 : vector<1x8xf32> to vector<8x8xf32>
    %194 = arith.mulf %192, %193 : vector<8x8xf32>
    %195 = arith.addf %191, %194 : vector<8x8xf32>
    %196 = vector.broadcast %183 : vector<8x1xf32> to vector<8x128xf32>
    %197 = vector.broadcast %182 : vector<1x128xf32> to vector<8x128xf32>
    %198 = arith.mulf %196, %197 : vector<8x128xf32>
    %199 = arith.subf %173, %198 : vector<8x128xf32>
    %200 = vector.broadcast %187 : vector<8x1xf32> to vector<8x128xf32>
    %201 = vector.broadcast %182 : vector<1x128xf32> to vector<8x128xf32>
    %202 = arith.mulf %200, %201 : vector<8x128xf32>
    %203 = arith.addf %199, %202 : vector<8x128xf32>
    %204 = vector.extract_strided_slice %195 {offsets = [2, 0], sizes = [1, 8], strides = [1, 1]} : vector<8x8xf32> to vector<1x8xf32>
    %205 = vector.extract_strided_slice %203 {offsets = [2, 0], sizes = [1, 128], strides = [1, 1]} : vector<8x128xf32> to vector<1x128xf32>
    %206 = vector.extract_strided_slice %204 {offsets = [0, 2], sizes = [1, 1], strides = [1, 1]} : vector<1x8xf32> to vector<1x1xf32>
    %cst_56 = arith.constant 1.000000e+00 : f32
    %207 = vector.broadcast %cst_56 : f32 to vector<1x1xf32>
    %208 = arith.divf %207, %206 : vector<1x1xf32>
    %209 = vector.broadcast %208 : vector<1x1xf32> to vector<1x8xf32>
    %210 = arith.mulf %204, %209 : vector<1x8xf32>
    %211 = vector.broadcast %208 : vector<1x1xf32> to vector<1x128xf32>
    %212 = arith.mulf %205, %211 : vector<1x128xf32>
    %213 = vector.extract_strided_slice %195 {offsets = [0, 2], sizes = [8, 1], strides = [1, 1]} : vector<8x8xf32> to vector<8x1xf32>
    %c2_i32_57 = arith.constant 2 : i32
    %214 = vector.broadcast %c2_i32_57 : i32 to vector<8x1xi32>
    %215 = arith.cmpi eq, %143, %214 : vector<8x1xi32>
    %216 = arith.extui %215 : vector<8x1xi1> to vector<8x1xi32>
    %217 = arith.sitofp %216 : vector<8x1xi32> to vector<8x1xf32>
    %218 = vector.broadcast %213 : vector<8x1xf32> to vector<8x8xf32>
    %219 = vector.broadcast %210 : vector<1x8xf32> to vector<8x8xf32>
    %220 = arith.mulf %218, %219 : vector<8x8xf32>
    %221 = arith.subf %195, %220 : vector<8x8xf32>
    %222 = vector.broadcast %217 : vector<8x1xf32> to vector<8x8xf32>
    %223 = vector.broadcast %210 : vector<1x8xf32> to vector<8x8xf32>
    %224 = arith.mulf %222, %223 : vector<8x8xf32>
    %225 = arith.addf %221, %224 : vector<8x8xf32>
    %226 = vector.broadcast %213 : vector<8x1xf32> to vector<8x128xf32>
    %227 = vector.broadcast %212 : vector<1x128xf32> to vector<8x128xf32>
    %228 = arith.mulf %226, %227 : vector<8x128xf32>
    %229 = arith.subf %203, %228 : vector<8x128xf32>
    %230 = vector.broadcast %217 : vector<8x1xf32> to vector<8x128xf32>
    %231 = vector.broadcast %212 : vector<1x128xf32> to vector<8x128xf32>
    %232 = arith.mulf %230, %231 : vector<8x128xf32>
    %233 = arith.addf %229, %232 : vector<8x128xf32>
    %234 = vector.extract_strided_slice %225 {offsets = [3, 0], sizes = [1, 8], strides = [1, 1]} : vector<8x8xf32> to vector<1x8xf32>
    %235 = vector.extract_strided_slice %233 {offsets = [3, 0], sizes = [1, 128], strides = [1, 1]} : vector<8x128xf32> to vector<1x128xf32>
    %236 = vector.extract_strided_slice %234 {offsets = [0, 3], sizes = [1, 1], strides = [1, 1]} : vector<1x8xf32> to vector<1x1xf32>
    %cst_58 = arith.constant 1.000000e+00 : f32
    %237 = vector.broadcast %cst_58 : f32 to vector<1x1xf32>
    %238 = arith.divf %237, %236 : vector<1x1xf32>
    %239 = vector.broadcast %238 : vector<1x1xf32> to vector<1x8xf32>
    %240 = arith.mulf %234, %239 : vector<1x8xf32>
    %241 = vector.broadcast %238 : vector<1x1xf32> to vector<1x128xf32>
    %242 = arith.mulf %235, %241 : vector<1x128xf32>
    %243 = vector.extract_strided_slice %225 {offsets = [0, 3], sizes = [8, 1], strides = [1, 1]} : vector<8x8xf32> to vector<8x1xf32>
    %c3_i32 = arith.constant 3 : i32
    %244 = vector.broadcast %c3_i32 : i32 to vector<8x1xi32>
    %245 = arith.cmpi eq, %143, %244 : vector<8x1xi32>
    %246 = arith.extui %245 : vector<8x1xi1> to vector<8x1xi32>
    %247 = arith.sitofp %246 : vector<8x1xi32> to vector<8x1xf32>
    %248 = vector.broadcast %243 : vector<8x1xf32> to vector<8x8xf32>
    %249 = vector.broadcast %240 : vector<1x8xf32> to vector<8x8xf32>
    %250 = arith.mulf %248, %249 : vector<8x8xf32>
    %251 = arith.subf %225, %250 : vector<8x8xf32>
    %252 = vector.broadcast %247 : vector<8x1xf32> to vector<8x8xf32>
    %253 = vector.broadcast %240 : vector<1x8xf32> to vector<8x8xf32>
    %254 = arith.mulf %252, %253 : vector<8x8xf32>
    %255 = arith.addf %251, %254 : vector<8x8xf32>
    %256 = vector.broadcast %243 : vector<8x1xf32> to vector<8x128xf32>
    %257 = vector.broadcast %242 : vector<1x128xf32> to vector<8x128xf32>
    %258 = arith.mulf %256, %257 : vector<8x128xf32>
    %259 = arith.subf %233, %258 : vector<8x128xf32>
    %260 = vector.broadcast %247 : vector<8x1xf32> to vector<8x128xf32>
    %261 = vector.broadcast %242 : vector<1x128xf32> to vector<8x128xf32>
    %262 = arith.mulf %260, %261 : vector<8x128xf32>
    %263 = arith.addf %259, %262 : vector<8x128xf32>
    %264 = vector.extract_strided_slice %255 {offsets = [4, 0], sizes = [1, 8], strides = [1, 1]} : vector<8x8xf32> to vector<1x8xf32>
    %265 = vector.extract_strided_slice %263 {offsets = [4, 0], sizes = [1, 128], strides = [1, 1]} : vector<8x128xf32> to vector<1x128xf32>
    %266 = vector.extract_strided_slice %264 {offsets = [0, 4], sizes = [1, 1], strides = [1, 1]} : vector<1x8xf32> to vector<1x1xf32>
    %cst_59 = arith.constant 1.000000e+00 : f32
    %267 = vector.broadcast %cst_59 : f32 to vector<1x1xf32>
    %268 = arith.divf %267, %266 : vector<1x1xf32>
    %269 = vector.broadcast %268 : vector<1x1xf32> to vector<1x8xf32>
    %270 = arith.mulf %264, %269 : vector<1x8xf32>
    %271 = vector.broadcast %268 : vector<1x1xf32> to vector<1x128xf32>
    %272 = arith.mulf %265, %271 : vector<1x128xf32>
    %273 = vector.extract_strided_slice %255 {offsets = [0, 4], sizes = [8, 1], strides = [1, 1]} : vector<8x8xf32> to vector<8x1xf32>
    %c4_i32 = arith.constant 4 : i32
    %274 = vector.broadcast %c4_i32 : i32 to vector<8x1xi32>
    %275 = arith.cmpi eq, %143, %274 : vector<8x1xi32>
    %276 = arith.extui %275 : vector<8x1xi1> to vector<8x1xi32>
    %277 = arith.sitofp %276 : vector<8x1xi32> to vector<8x1xf32>
    %278 = vector.broadcast %273 : vector<8x1xf32> to vector<8x8xf32>
    %279 = vector.broadcast %270 : vector<1x8xf32> to vector<8x8xf32>
    %280 = arith.mulf %278, %279 : vector<8x8xf32>
    %281 = arith.subf %255, %280 : vector<8x8xf32>
    %282 = vector.broadcast %277 : vector<8x1xf32> to vector<8x8xf32>
    %283 = vector.broadcast %270 : vector<1x8xf32> to vector<8x8xf32>
    %284 = arith.mulf %282, %283 : vector<8x8xf32>
    %285 = arith.addf %281, %284 : vector<8x8xf32>
    %286 = vector.broadcast %273 : vector<8x1xf32> to vector<8x128xf32>
    %287 = vector.broadcast %272 : vector<1x128xf32> to vector<8x128xf32>
    %288 = arith.mulf %286, %287 : vector<8x128xf32>
    %289 = arith.subf %263, %288 : vector<8x128xf32>
    %290 = vector.broadcast %277 : vector<8x1xf32> to vector<8x128xf32>
    %291 = vector.broadcast %272 : vector<1x128xf32> to vector<8x128xf32>
    %292 = arith.mulf %290, %291 : vector<8x128xf32>
    %293 = arith.addf %289, %292 : vector<8x128xf32>
    %294 = vector.extract_strided_slice %285 {offsets = [5, 0], sizes = [1, 8], strides = [1, 1]} : vector<8x8xf32> to vector<1x8xf32>
    %295 = vector.extract_strided_slice %293 {offsets = [5, 0], sizes = [1, 128], strides = [1, 1]} : vector<8x128xf32> to vector<1x128xf32>
    %296 = vector.extract_strided_slice %294 {offsets = [0, 5], sizes = [1, 1], strides = [1, 1]} : vector<1x8xf32> to vector<1x1xf32>
    %cst_60 = arith.constant 1.000000e+00 : f32
    %297 = vector.broadcast %cst_60 : f32 to vector<1x1xf32>
    %298 = arith.divf %297, %296 : vector<1x1xf32>
    %299 = vector.broadcast %298 : vector<1x1xf32> to vector<1x8xf32>
    %300 = arith.mulf %294, %299 : vector<1x8xf32>
    %301 = vector.broadcast %298 : vector<1x1xf32> to vector<1x128xf32>
    %302 = arith.mulf %295, %301 : vector<1x128xf32>
    %303 = vector.extract_strided_slice %285 {offsets = [0, 5], sizes = [8, 1], strides = [1, 1]} : vector<8x8xf32> to vector<8x1xf32>
    %c5_i32 = arith.constant 5 : i32
    %304 = vector.broadcast %c5_i32 : i32 to vector<8x1xi32>
    %305 = arith.cmpi eq, %143, %304 : vector<8x1xi32>
    %306 = arith.extui %305 : vector<8x1xi1> to vector<8x1xi32>
    %307 = arith.sitofp %306 : vector<8x1xi32> to vector<8x1xf32>
    %308 = vector.broadcast %303 : vector<8x1xf32> to vector<8x8xf32>
    %309 = vector.broadcast %300 : vector<1x8xf32> to vector<8x8xf32>
    %310 = arith.mulf %308, %309 : vector<8x8xf32>
    %311 = arith.subf %285, %310 : vector<8x8xf32>
    %312 = vector.broadcast %307 : vector<8x1xf32> to vector<8x8xf32>
    %313 = vector.broadcast %300 : vector<1x8xf32> to vector<8x8xf32>
    %314 = arith.mulf %312, %313 : vector<8x8xf32>
    %315 = arith.addf %311, %314 : vector<8x8xf32>
    %316 = vector.broadcast %303 : vector<8x1xf32> to vector<8x128xf32>
    %317 = vector.broadcast %302 : vector<1x128xf32> to vector<8x128xf32>
    %318 = arith.mulf %316, %317 : vector<8x128xf32>
    %319 = arith.subf %293, %318 : vector<8x128xf32>
    %320 = vector.broadcast %307 : vector<8x1xf32> to vector<8x128xf32>
    %321 = vector.broadcast %302 : vector<1x128xf32> to vector<8x128xf32>
    %322 = arith.mulf %320, %321 : vector<8x128xf32>
    %323 = arith.addf %319, %322 : vector<8x128xf32>
    %324 = vector.extract_strided_slice %315 {offsets = [6, 0], sizes = [1, 8], strides = [1, 1]} : vector<8x8xf32> to vector<1x8xf32>
    %325 = vector.extract_strided_slice %323 {offsets = [6, 0], sizes = [1, 128], strides = [1, 1]} : vector<8x128xf32> to vector<1x128xf32>
    %326 = vector.extract_strided_slice %324 {offsets = [0, 6], sizes = [1, 1], strides = [1, 1]} : vector<1x8xf32> to vector<1x1xf32>
    %cst_61 = arith.constant 1.000000e+00 : f32
    %327 = vector.broadcast %cst_61 : f32 to vector<1x1xf32>
    %328 = arith.divf %327, %326 : vector<1x1xf32>
    %329 = vector.broadcast %328 : vector<1x1xf32> to vector<1x8xf32>
    %330 = arith.mulf %324, %329 : vector<1x8xf32>
    %331 = vector.broadcast %328 : vector<1x1xf32> to vector<1x128xf32>
    %332 = arith.mulf %325, %331 : vector<1x128xf32>
    %333 = vector.extract_strided_slice %315 {offsets = [0, 6], sizes = [8, 1], strides = [1, 1]} : vector<8x8xf32> to vector<8x1xf32>
    %c6_i32 = arith.constant 6 : i32
    %334 = vector.broadcast %c6_i32 : i32 to vector<8x1xi32>
    %335 = arith.cmpi eq, %143, %334 : vector<8x1xi32>
    %336 = arith.extui %335 : vector<8x1xi1> to vector<8x1xi32>
    %337 = arith.sitofp %336 : vector<8x1xi32> to vector<8x1xf32>
    %338 = vector.broadcast %333 : vector<8x1xf32> to vector<8x8xf32>
    %339 = vector.broadcast %330 : vector<1x8xf32> to vector<8x8xf32>
    %340 = arith.mulf %338, %339 : vector<8x8xf32>
    %341 = arith.subf %315, %340 : vector<8x8xf32>
    %342 = vector.broadcast %337 : vector<8x1xf32> to vector<8x8xf32>
    %343 = vector.broadcast %330 : vector<1x8xf32> to vector<8x8xf32>
    %344 = arith.mulf %342, %343 : vector<8x8xf32>
    %345 = arith.addf %341, %344 : vector<8x8xf32>
    %346 = vector.broadcast %333 : vector<8x1xf32> to vector<8x128xf32>
    %347 = vector.broadcast %332 : vector<1x128xf32> to vector<8x128xf32>
    %348 = arith.mulf %346, %347 : vector<8x128xf32>
    %349 = arith.subf %323, %348 : vector<8x128xf32>
    %350 = vector.broadcast %337 : vector<8x1xf32> to vector<8x128xf32>
    %351 = vector.broadcast %332 : vector<1x128xf32> to vector<8x128xf32>
    %352 = arith.mulf %350, %351 : vector<8x128xf32>
    %353 = arith.addf %349, %352 : vector<8x128xf32>
    %354 = vector.extract_strided_slice %345 {offsets = [7, 0], sizes = [1, 8], strides = [1, 1]} : vector<8x8xf32> to vector<1x8xf32>
    %355 = vector.extract_strided_slice %353 {offsets = [7, 0], sizes = [1, 128], strides = [1, 1]} : vector<8x128xf32> to vector<1x128xf32>
    %356 = vector.extract_strided_slice %354 {offsets = [0, 7], sizes = [1, 1], strides = [1, 1]} : vector<1x8xf32> to vector<1x1xf32>
    %cst_62 = arith.constant 1.000000e+00 : f32
    %357 = vector.broadcast %cst_62 : f32 to vector<1x1xf32>
    %358 = arith.divf %357, %356 : vector<1x1xf32>
    %359 = vector.broadcast %358 : vector<1x1xf32> to vector<1x128xf32>
    %360 = arith.mulf %355, %359 : vector<1x128xf32>
    %361 = vector.extract_strided_slice %345 {offsets = [0, 7], sizes = [8, 1], strides = [1, 1]} : vector<8x8xf32> to vector<8x1xf32>
    %c7_i32 = arith.constant 7 : i32
    %362 = vector.broadcast %c7_i32 : i32 to vector<8x1xi32>
    %363 = arith.cmpi eq, %143, %362 : vector<8x1xi32>
    %364 = arith.extui %363 : vector<8x1xi1> to vector<8x1xi32>
    %365 = arith.sitofp %364 : vector<8x1xi32> to vector<8x1xf32>
    %366 = vector.broadcast %361 : vector<8x1xf32> to vector<8x128xf32>
    %367 = vector.broadcast %360 : vector<1x128xf32> to vector<8x128xf32>
    %368 = arith.mulf %366, %367 : vector<8x128xf32>
    %369 = arith.subf %353, %368 : vector<8x128xf32>
    %370 = vector.broadcast %365 : vector<8x1xf32> to vector<8x128xf32>
    %371 = vector.broadcast %360 : vector<1x128xf32> to vector<8x128xf32>
    %372 = arith.mulf %370, %371 : vector<8x128xf32>
    %373 = arith.addf %369, %372 : vector<8x128xf32>
    %cst_63 = arith.constant dense<0.000000e+00> : vector<8x128xf32>
    %374 = tpu.matmul %127, %373, %cst_63 {dimension_numbers = #tpu.dot_dimension_numbers<[1], [0], [0], [1], [0, 0, 1, 1], [], []>} : vector<8x8xf32>, vector<8x128xf32>, vector<8x128xf32> -> vector<8x128xf32>
    %375 = tpu.iota {dimensions = array<i32: 1>} : vector<8x128xi32>
    %c2_i32_64 = arith.constant 2 : i32
    %376 = vector.broadcast %c2_i32_64 : i32 to vector<8x128xi32>
    %377 = arith.cmpi slt, %375, %376 : vector<8x128xi32>
    %cst_65 = arith.constant 5.000000e-01 : f32
    %378 = vector.broadcast %cst_65 : f32 to vector<8x128xf32>
    %379 = arith.subf %79, %378 : vector<8x128xf32>
    %cst_66 = arith.constant 0.000000e+00 : f32
    %380 = vector.broadcast %cst_66 : f32 to vector<8x128xf32>
    %381 = arith.select %377, %379, %380 : vector<8x128xi1>, vector<8x128xf32>
    %382 = arith.subf %374, %381 : vector<8x128xf32>
    %383 = arith.mulf %382, %382 : vector<8x128xf32>
    %cst_67 = arith.constant dense<0.000000e+00> : vector<8xf32>
    %384 = vector.multi_reduction <add>, %383, %cst_67 [1] : vector<8x128xf32> to vector<8xf32>
    %385 = vector.shape_cast %384 : vector<8xf32> to vector<8x1xf32>
    %cst_68 = arith.constant dense<0.000000e+00> : vector<1xf32>
    %386 = vector.multi_reduction <add>, %385, %cst_68 [0] : vector<8x1xf32> to vector<1xf32>
    %387 = vector.shape_cast %386 : vector<1xf32> to vector<1x1xf32>
    %cst_69 = arith.constant 1.600000e+01 : f32
    %388 = vector.broadcast %cst_69 : f32 to vector<1x1xf32>
    %389 = arith.divf %387, %388 : vector<1x1xf32>
    %390 = tpu.iota {dimensions = array<i32: 1>} : vector<8x128xi32>
    %c2_i32_70 = arith.constant 2 : i32
    %391 = vector.broadcast %c2_i32_70 : i32 to vector<8x128xi32>
    %392 = arith.cmpi slt, %390, %391 : vector<8x128xi32>
    %cst_71 = arith.constant -1.000000e+30 : f32
    %393 = vector.broadcast %cst_71 : f32 to vector<8x128xf32>
    %394 = arith.select %392, %17, %393 : vector<8x128xi1>, vector<8x128xf32>
    %cst_72 = arith.constant 3.000000e+00 : f32
    %395 = vector.broadcast %cst_72 : f32 to vector<8x128xf32>
    %396 = arith.divf %394, %395 : vector<8x128xf32>
    %cst_73 = arith.constant dense<0xFF800000> : vector<8xf32>
    %397 = vector.multi_reduction <maximumf>, %396, %cst_73 [1] : vector<8x128xf32> to vector<8xf32>
    %398 = vector.shape_cast %397 : vector<8xf32> to vector<8x1xf32>
    %399 = vector.broadcast %398 : vector<8x1xf32> to vector<8x128xf32>
    %400 = arith.subf %396, %399 : vector<8x128xf32>
    %401 = math.exp %400 : vector<8x128xf32>
    %cst_74 = arith.constant dense<0.000000e+00> : vector<8xf32>
    %402 = vector.multi_reduction <add>, %401, %cst_74 [1] : vector<8x128xf32> to vector<8xf32>
    %403 = vector.shape_cast %402 : vector<8xf32> to vector<8x1xf32>
    %404 = vector.broadcast %403 : vector<8x1xf32> to vector<8x128xf32>
    %405 = arith.divf %401, %404 : vector<8x128xf32>
    %cst_75 = arith.constant 9.99999974E-6 : f32
    %406 = vector.broadcast %cst_75 : f32 to vector<8x128xf32>
    %407 = arith.addf %405, %406 : vector<8x128xf32>
    %408 = math.log %407 : vector<8x128xf32>
    %409 = arith.mulf %405, %408 : vector<8x128xf32>
    %cst_76 = arith.constant dense<0.000000e+00> : vector<8xf32>
    %410 = vector.multi_reduction <add>, %409, %cst_76 [1] : vector<8x128xf32> to vector<8xf32>
    %411 = vector.shape_cast %410 : vector<8xf32> to vector<8x1xf32>
    %cst_77 = arith.constant 0.000000e+00 : f32
    %412 = vector.broadcast %cst_77 : f32 to vector<8x1xf32>
    %413 = arith.subf %412, %411 : vector<8x1xf32>
    %cst_78 = arith.constant 0.000000e+00 : f32
    %414 = vector.broadcast %cst_78 : f32 to vector<8x1xf32>
    %415 = arith.subf %414, %413 : vector<8x1xf32>
    %416 = math.exp %415 : vector<8x1xf32>
    %cst_79 = arith.constant 1.000000e+00 : f32
    %417 = vector.broadcast %cst_79 : f32 to vector<8x1xf32>
    %418 = arith.addf %417, %416 : vector<8x1xf32>
    %cst_80 = arith.constant 8.000000e+00 : f32
    %419 = vector.broadcast %cst_80 : f32 to vector<8x1xf32>
    %420 = arith.mulf %419, %418 : vector<8x1xf32>
    %cst_81 = arith.constant dense<0.000000e+00> : vector<1xf32>
    %421 = vector.multi_reduction <add>, %418, %cst_81 [0] : vector<8x1xf32> to vector<1xf32>
    %422 = vector.shape_cast %421 : vector<1xf32> to vector<1x1xf32>
    %423 = vector.broadcast %422 : vector<1x1xf32> to vector<8x1xf32>
    %424 = arith.divf %420, %423 : vector<8x1xf32>
    %425 = vector.broadcast %424 : vector<8x1xf32> to vector<8x128xf32>
    %426 = arith.mulf %405, %425 : vector<8x128xf32>
    %cst_82 = arith.constant dense<0.000000e+00> : vector<128xf32>
    %427 = vector.multi_reduction <add>, %426, %cst_82 [0] : vector<8x128xf32> to vector<128xf32>
    %428 = vector.shape_cast %427 : vector<128xf32> to vector<1x128xf32>
    %cst_83 = arith.constant dense<0.000000e+00> : vector<1xf32>
    %429 = vector.multi_reduction <add>, %428, %cst_83 [1] : vector<1x128xf32> to vector<1xf32>
    %430 = vector.shape_cast %429 : vector<1xf32> to vector<1x1xf32>
    %cst_84 = arith.constant 2.000000e+00 : f32
    %431 = vector.broadcast %cst_84 : f32 to vector<1x1xf32>
    %432 = arith.divf %430, %431 : vector<1x1xf32>
    %cst_85 = arith.constant 9.99999996E-13 : f32
    %433 = vector.broadcast %cst_85 : f32 to vector<8x128xf32>
    %434 = arith.addf %405, %433 : vector<8x128xf32>
    %435 = math.log %434 : vector<8x128xf32>
    %cst_86 = arith.constant 1.900000e+00 : f32
    %436 = vector.broadcast %cst_86 : f32 to vector<8x128xf32>
    %437 = arith.mulf %436, %435 : vector<8x128xf32>
    %438 = math.exp %437 : vector<8x128xf32>
    %439 = tpu.iota {dimensions = array<i32: 1>} : vector<1x128xi32>
    %c2_i32_87 = arith.constant 2 : i32
    %440 = vector.broadcast %c2_i32_87 : i32 to vector<1x128xi32>
    %441 = arith.cmpi slt, %439, %440 : vector<1x128xi32>
    %cst_88 = arith.constant 1.000000e+00 : f32
    %442 = vector.broadcast %cst_88 : f32 to vector<1x128xf32>
    %443 = arith.select %441, %428, %442 : vector<1x128xi1>, vector<1x128xf32>
    %444 = tpu.iota {dimensions = array<i32: 1>} : vector<8x128xi32>
    %c2_i32_89 = arith.constant 2 : i32
    %445 = vector.broadcast %c2_i32_89 : i32 to vector<8x128xi32>
    %446 = arith.cmpi slt, %444, %445 : vector<8x128xi32>
    %447 = vector.broadcast %443 : vector<1x128xf32> to vector<8x128xf32>
    %448 = arith.divf %438, %447 : vector<8x128xf32>
    %449 = vector.broadcast %424 : vector<8x1xf32> to vector<8x128xf32>
    %450 = arith.mulf %448, %449 : vector<8x128xf32>
    %cst_90 = arith.constant 0.000000e+00 : f32
    %451 = vector.broadcast %cst_90 : f32 to vector<8x128xf32>
    %452 = arith.select %446, %450, %451 : vector<8x128xi1>, vector<8x128xf32>
    %cst_91 = arith.constant dense<0.000000e+00> : vector<8xf32>
    %453 = vector.multi_reduction <add>, %452, %cst_91 [1] : vector<8x128xf32> to vector<8xf32>
    %454 = vector.shape_cast %453 : vector<8xf32> to vector<8x1xf32>
    %cst_92 = arith.constant 1.000000e+00 : f32
    %455 = vector.broadcast %cst_92 : f32 to vector<1x1xf32>
    %456 = arith.divf %455, %432 : vector<1x1xf32>
    %457 = vector.broadcast %456 : vector<1x1xf32> to vector<8x1xf32>
    %458 = arith.subf %457, %454 : vector<8x1xf32>
    %cst_93 = arith.constant dense<0.000000e+00> : vector<1xf32>
    %459 = vector.multi_reduction <add>, %458, %cst_93 [0] : vector<8x1xf32> to vector<1xf32>
    %460 = vector.shape_cast %459 : vector<1xf32> to vector<1x1xf32>
    %cst_94 = arith.constant 1.11111116 : f32
    %461 = vector.broadcast %cst_94 : f32 to vector<1x1xf32>
    %462 = arith.mulf %461, %460 : vector<1x1xf32>
    %cst_95 = arith.constant 8.000000e-02 : f32
    %463 = vector.broadcast %cst_95 : f32 to vector<1x1xf32>
    %464 = arith.mulf %462, %463 : vector<1x1xf32>
    %465 = arith.addf %101, %464 : vector<1x1xf32>
    %cst_96 = arith.constant 2.000000e+00 : f32
    %466 = vector.broadcast %cst_96 : f32 to vector<1x1xf32>
    %467 = arith.mulf %389, %466 : vector<1x1xf32>
    %468 = arith.addf %465, %467 : vector<1x1xf32>
    %cst_97 = arith.constant 0.000000e+00 : f32
    %469 = vector.broadcast %cst_97 : f32 to vector<1x1xf32>
    %470 = arith.cmpf one, %78, %469 : vector<1x1xf32>
    %cst_98 = arith.constant 5.000000e-01 : f32
    %471 = vector.broadcast %cst_98 : f32 to vector<1x1xf32>
    %472 = arith.mulf %78, %471 : vector<1x1xf32>
    %473 = arith.addf %468, %472 : vector<1x1xf32>
    %474 = arith.select %470, %473, %468 : vector<1x1xi1>, vector<1x1xf32>
    %475 = vector.shape_cast %474 : vector<1x1xf32> to vector<1x1xf32>
    %476 = vector.broadcast %475 : vector<1x1xf32> to vector<8x128xf32>
    %c0_99 = arith.constant 0 : index
    %c0_100 = arith.constant 0 : index
    %477 = vector.load %arg9[%c0_99, %c0_100] : memref<8x128xf32, #tpu.memory_space<vmem>>, vector<8x128xf32>
    tpu.vector_store %arg9[%c0_99, %c0_100], %476 {strides = array<i32>} : memref<8x128xf32, #tpu.memory_space<vmem>>, vector<8x128xf32>,
    return
  }
  func.func @transform_0(%arg0: i32) -> (i32, i32) {
    %c0_i32 = arith.constant 0 : i32
    %c0_i32_0 = arith.constant 0 : i32
    %c0_i32_1 = arith.constant 0 : i32
    return %c0_i32, %c0_i32_0 : i32, i32
  }
  func.func @transform_1(%arg0: i32) -> (i32, i32) {
    %c0_i32 = arith.constant 0 : i32
    %c0_i32_0 = arith.constant 0 : i32
    %c0_i32_1 = arith.constant 0 : i32
    return %c0_i32, %c0_i32_0 : i32, i32
  }
  func.func @transform_2(%arg0: i32) -> (i32, i32) {
    %c0_i32 = arith.constant 0 : i32
    %c0_i32_0 = arith.constant 0 : i32
    %c0_i32_1 = arith.constant 0 : i32
    return %c0_i32, %c0_i32_0 : i32, i32
  }
  func.func @transform_3(%arg0: i32) -> (i32, i32) {
    %c0_i32 = arith.constant 0 : i32
    %c0_i32_0 = arith.constant 0 : i32
    %c0_i32_1 = arith.constant 0 : i32
    return %c0_i32, %c0_i32_0 : i32, i32
  }
  func.func @transform_4(%arg0: i32) -> (i32, i32) {
    %c0_i32 = arith.constant 0 : i32
    %c0_i32_0 = arith.constant 0 : i32
    %c0_i32_1 = arith.constant 0 : i32
    return %c0_i32, %c0_i32_0 : i32, i32
  }
  func.func @transform_5(%arg0: i32) -> (i32, i32) {
    %c0_i32 = arith.constant 0 : i32
    %c0_i32_0 = arith.constant 0 : i32
    %c0_i32_1 = arith.constant 0 : i32
    return %c0_i32, %c0_i32_0 : i32, i32
  }
  func.func @transform_6(%arg0: i32) -> (i32, i32) {
    %c0_i32 = arith.constant 0 : i32
    %c0_i32_0 = arith.constant 0 : i32
    %c0_i32_1 = arith.constant 0 : i32
    return %c0_i32, %c0_i32_0 : i32, i32
  }
  func.func @transform_7(%arg0: i32) -> (i32, i32) {
    %c0_i32 = arith.constant 0 : i32
    %c0_i32_0 = arith.constant 0 : i32
    %c0_i32_1 = arith.constant 0 : i32
    return %c0_i32, %c0_i32_0 : i32, i32
  }
  func.func @transform_8(%arg0: i32) -> (i32, i32) {
    %c0_i32 = arith.constant 0 : i32
    %c0_i32_0 = arith.constant 0 : i32
    %c0_i32_1 = arith.constant 0 : i32
    return %c0_i32, %c0_i32_0 : i32, i32
  }
}

</mosaic_0001>

<bundles_post_ra>
// kernel: cst_module_forward.1
= control target key start
LH: loop header
LB: loop body
LE: loop exit
PB: predicated region body
PF: predicated region fallthrough
CT: control target
= control target key end

     0   :  { %v2354_v57 = vmov 0.0   ;;  %vm2355_vm0 = vmmov 0   ;;  %vm1590_vm14 = vcmask 64512   ;;  %s3232_s3 = inlined_call_operand.vmem [shape: bf16[768,128], index: 3, kind: input, shape index: {}]   ;;  %s3233_s0 = inlined_call_operand.vmem [shape: bf16[8,768], index: 0, kind: input, shape index: {}]   ;;  %s3234_s5 = inlined_call_operand.vmem [shape: f32[128,128], index: 5, kind: input, shape index: {}]   ;;  %s3235_s1 = inlined_call_operand.vmem [shape: bf16[8,768], index: 1, kind: input, shape index: {}]   ;;  %s3236_s4 = inlined_call_operand.vmem [shape: f32[1,128], index: 4, kind: input, shape index: {}]   ;;  %s3237_s2 = inlined_call_operand.vmem [shape: bf16[8,768], index: 2, kind: input, shape index: {}]   ;;  %s3238_s6 = inlined_call_operand.vmem [shape: f32[1,128], index: 6, kind: input, shape index: {}]   ;;  %s3239_s7 = inlined_call_operand.vmem [shape: f32[8,128], index: 7, kind: input, shape index: {}]   ;;  %s3240_s8 = inlined_call_operand.vmem [shape: f32[8,128], index: 8, kind: output, shape index: {}]  }
   0x1   :  { %v2412_v0 = vld [vmem:[%s3232_s3 + $0x78] sm:$0xff]   ;;  %v2435_v4 = vld [vmem:[%s3232_s3 + $0x70] sm:$0xff]   ;;  %v2459_v8 = vld [vmem:[%s3232_s3 + $0x68] sm:$0xff]  }
   0x2   :  { %v2417_v1 = vld [vmem:[%s3232_s3 + $0x38] sm:$0xff]   ;;  %1840 = vmatprep.subr.bf16.mxu0 %v2412_v0  ;;  %v2441_v5 = vld [vmem:[%s3232_s3 + $0x30] sm:$0xff]   ;;  %v2465_v9 = vld [vmem:[%s3232_s3 + $0x28] sm:$0xff]  }
   0x3   :  { %v2423_v2 = vld [vmem:[%s3232_s3 + $0xf8] sm:$0xff]   ;;  %1841 = vmatpush3.bf16.msra.mxu0 %v2417_v1  ;;  %v2447_v6 = vld [vmem:[%s3232_s3 + $0xf0] sm:$0xff]   ;;  %v2471_v10 = vld [vmem:[%s3232_s3 + $0xe8] sm:$0xff]  }
   0x4   :  { %v2429_v3 = vld [vmem:[%s3232_s3 + $0xb8] sm:$0xff]   ;;  %1862 = vmatprep.subr.bf16.mxu1 %v2423_v2  ;;  %1842 = vmatprep.subr.bf16.mxu0 %v2435_v4  ;;  %v2453_v7 = vld [vmem:[%s3232_s3 + $0xb0] sm:$0xff]   ;;  %v2477_v11 = vld [vmem:[%s3232_s3 + $0xa8] sm:$0xff]  }
   0x5   :  { %1863 = vmatpush3.bf16.msra.mxu1 %v2429_v3  ;;  %v2483_v12 = vld [vmem:[%s3232_s3 + $0x60] sm:$0xff]   ;;  %v2507_v16 = vld [vmem:[%s3232_s3 + $0x58] sm:$0xff]   ;;  %v2531_v20 = vld [vmem:[%s3232_s3 + $0x50] sm:$0xff]  }
   0x6   :  { %1864 = vmatprep.subr.bf16.mxu1 %v2447_v6  ;;  %v2489_v13 = vld [vmem:[%s3232_s3 + $0x20] sm:$0xff]   ;;  %v2513_v17 = vld [vmem:[%s3232_s3 + $0x18] sm:$0xff]   ;;  %v2537_v21 = vld [vmem:[%s3232_s3 + $0x10] sm:$0xff]  }
   0x7   :  { %1843 = vmatpush3.bf16.msra.mxu0 %v2441_v5  ;;  %v2495_v14 = vld [vmem:[%s3232_s3 + $0xe0] sm:$0xff]   ;;  %v2519_v18 = vld [vmem:[%s3232_s3 + $0xd8] sm:$0xff]   ;;  %v2543_v22 = vld [vmem:[%s3232_s3 + $0xd0] sm:$0xff]  }
   0x8   :  { %1844 = vmatprep.subr.bf16.mxu0 %v2459_v8  ;;  %v2501_v15 = vld [vmem:[%s3232_s3 + $0xa0] sm:$0xff]   ;;  %v2525_v19 = vld [vmem:[%s3232_s3 + $0x98] sm:$0xff]   ;;  %v2549_v23 = vld [vmem:[%s3232_s3 + $0x90] sm:$0xff]  }
   0x9   :  { %1865 = vmatpush3.bf16.msra.mxu1 %v2453_v7  ;;  %v2555_v24 = vld [vmem:[%s3232_s3 + $0x48] sm:$0xff]   ;;  %v2579_v28 = vld [vmem:[%s3232_s3 + $0x40] sm:$0xff]   ;;  %v2606_v35 = vld [vmem:[%s3232_s3 + $0x178] sm:$0xff]  }
   0xa   :  { %1866 = vmatprep.subr.bf16.mxu1 %v2471_v10  ;;  %v2561_v25 = vld [vmem:[%s3232_s3 + $0x8] sm:$0xff]   ;;  %v2585_v29 = vld [vmem:[%s3232_s3] sm:$0xff]   ;;  %v2615_v39 = vld [vmem:[%s3232_s3 + $0x138] sm:$0xff]  }
   0xb   :  { %1845 = vmatpush3.bf16.msra.mxu0 %v2465_v9  ;;  %v2567_v26 = vld [vmem:[%s3232_s3 + $0xc8] sm:$0xff]   ;;  %v2591_v30 = vld [vmem:[%s3232_s3 + $0xc0] sm:$0xff]   ;;  %v2621_v40 = vld [vmem:[%s3232_s3 + $0x170] sm:$0xff]  }
   0xc   :  { %1846 = vmatprep.subr.bf16.mxu0 %v2483_v12  ;;  %v2573_v27 = vld [vmem:[%s3232_s3 + $0x88] sm:$0xff]   ;;  %v144_v31 = vld [vmem:[%s3233_s0] sm:$0xff]  ;;  %v2627_v41 = vld [vmem:[%s3232_s3 + $0x130] sm:$0xff]  }
   0xd   :  { %1867 = vmatpush3.bf16.msra.mxu1 %v2477_v11  ;;  %v1757_v32 = vcombine.low %v144_v31, %v144_v31  ;;  %v1758_v33 = vcombine.high %v144_v31, %v144_v31  ;;  %v2601_v34 = vld [vmem:[%s3232_s3 + $0x80] sm:$0xff]   ;;  %v145_v36 = vld [vmem:[%s3233_s0 + $0x8] sm:$0xff]  ;;  %v2657_v46 = vld [vmem:[%s3232_s3 + $0x158] sm:$0xff]  }
   0xe   :  { %1868 = vmatprep.subr.bf16.mxu1 %v2495_v14  ;;  %v1759_v37 = vcombine.low %v145_v36, %v145_v36  ;;  %v1760_v38 = vcombine.high %v145_v36, %v145_v36  ;;  %v2633_v42 = vld [vmem:[%s3232_s3 + $0x168] sm:$0xff]   ;;  %v2645_v44 = vld [vmem:[%s3232_s3 + $0x160] sm:$0xff]   ;;  %v2663_v47 = vld [vmem:[%s3232_s3 + $0x118] sm:$0xff]  }
   0xf   :  { %1847 = vmatpush3.bf16.msra.mxu0 %v2489_v13  ;;  %494 = vmatprep.mubr.bf16.mxu0 %v1758_v33  ;;  %v2639_v43 = vld [vmem:[%s3232_s3 + $0x128] sm:$0xff]   ;;  %v2651_v45 = vld [vmem:[%s3232_s3 + $0x120] sm:$0xff]   ;;  %v146_v48 = vld [vmem:[%s3233_s0 + $0x10] sm:$0xff] }
  0x10   :  { %1848 = vmatprep.subr.bf16.mxu0 %v2507_v16  ;;  %534 = vmatprep.mubr.bf16.mxu1 %v1760_v38  ;;  %v2672_v49 = vld [vmem:[%s3232_s3 + $0x150] sm:$0xff]   ;;  %v1762_v50 = vcombine.high %v146_v48, %v146_v48  ;;  %v2684_v52 = vld [vmem:[%s3232_s3 + $0x148] sm:$0xff]   ;;  %v2696_v54 = vld [vmem:[%s3232_s3 + $0x140] sm:$0xff]   ;;  %v1761_v56 = vcombine.low %v146_v48, %v146_v48 }
  0x11   :  { %1869 = vmatpush3.bf16.msra.mxu1 %v2501_v15  ;;  %v2678_v51 = vld [vmem:[%s3232_s3 + $0x110] sm:$0xff]   ;;  %v2690_v53 = vld [vmem:[%s3232_s3 + $0x108] sm:$0xff]   ;;  %v2702_v55 = vld [vmem:[%s3232_s3 + $0x100] sm:$0xff]  }
  0x12   :  { %1870 = vmatprep.subr.bf16.mxu1 %v2519_v18  ;;  %v2727_v58 = vld [vmem:[%s3234_s5 + $0x78] sm:$0xff]  ;;  %v2733_v59 = vld [vmem:[%s3234_s5 + $0x70] sm:$0xff]  ;;  %v2739_v60 = vld [vmem:[%s3234_s5 + $0x68] sm:$0xff] }
  0x13   :  { %1849 = vmatpush3.bf16.msra.mxu0 %v2513_v17  ;;  %v2746_v61 = vld [vmem:[%s3234_s5 + $0x60] sm:$0xff]  ;;  %v2753_v62 = vld [vmem:[%s3234_s5 + $0x58] sm:$0xff]  ;;  %v2760_v63 = vld [vmem:[%s3234_s5 + $0x50] sm:$0xff] }
  0x14   :  { %1850 = vmatprep.subr.bf16.mxu0 %v2531_v20  ;;  %v2767_v31 = vld [vmem:[%s3234_s5 + $0x48] sm:$0xff]  ;;  %v2781_v33 = vld [vmem:[%s3234_s5 + $0x38] sm:$0xff]  ;;  %v2788_v36 = vld [vmem:[%s3234_s5 + $0x30] sm:$0xff] }
  0x15   :  { %1871 = vmatpush3.bf16.msra.mxu1 %v2525_v19  ;;  %3249 = vst [vmem:[#allocation2_spill] sm:$0xff] %v2788_v36  ;;  %v2802_v38 = vld [vmem:[%s3234_s5 + $0x20] sm:$0xff]  ;;  %v2809_v48 = vld [vmem:[%s3234_s5 + $0x18] sm:$0xff] }
  0x16   :  { %1872 = vmatprep.subr.bf16.mxu1 %v2543_v22  ;;  %3251 = vst [vmem:[#allocation4_spill] sm:$0xff] %v2809_v48 }
  0x17   :  { %1851 = vmatpush3.bf16.msra.mxu0 %v2537_v21 }
  0x18   :  { %1852 = vmatprep.subr.bf16.mxu0 %v2555_v24 }
  0x19   :  { %1873 = vmatpush3.bf16.msra.mxu1 %v2549_v23 }
  0x1a   :  { %1874 = vmatprep.subr.bf16.mxu1 %v2567_v26 }
  0x1b   :  { %1853 = vmatpush3.bf16.msra.mxu0 %v2561_v25 }
  0x1c   :  { %1854 = vmatprep.subr.bf16.mxu0 %v2579_v28 }
  0x1d   :  { %1875 = vmatpush3.bf16.msra.mxu1 %v2573_v27 }
  0x1e   :  { %1876 = vmatprep.subr.bf16.mxu1 %v2591_v30 }
  0x1f   :  { %1855 = vmatpush3.bf16.msra.mxu0 %v2585_v29 }
  0x20   :  { %1884 = vmatprep.subr.bf16.mxu0 %v2606_v35 }
  0x21   :  { %1877 = vmatpush3.bf16.msra.mxu1 %v2601_v34 }
  0x22   :  { %495 = vmatmul.mubr.bf16.vlgmr.msra.gmra.mxu0 %v1757_v32  ;;  %2095 = vmatprep.subr.mxu1 %v2354_v57  ;;  %v2774_v32 = vld [vmem:[%s3234_s5 + $0x40] sm:$0xff] }
  0x23   :  { %1885 = vmatpush3.bf16.msra.mxu0 %v2615_v39  ;;  %574 = vmatprep.mubr.bf16.mxu0 %v1762_v50  ;;  %v658_v50 = vld [vmem:[%s3235_s1] sm:$0xff] }
  0x24   :  { %535 = vmatmul.mubr.bf16.vlgmr.msra.gmra.mxu1 %v1759_v37  ;;  %1886 = vmatprep.subr.bf16.mxu0 %v2621_v40  ;;  %v2795_v37 = vld [vmem:[%s3234_s5 + $0x28] sm:$0xff] }
  0x25   :  { %2096 = vmatpush3.msra.mxu1 %v2727_v58  ;;  %3250 = vst [vmem:[#allocation3_spill] sm:$0xff] %v2795_v37  ;;  %2127 = vmatprep.mubr.msk.f32.mxu1 %vm2355_vm0, %v2354_v57 }
  0x26   :  { %2097 = vmatprep.subr.mxu1 %v2354_v57 }
  0x27   :  { %1887 = vmatpush3.bf16.msra.mxu0 %v2627_v41  ;;  %2098 = vmatpush3.msra.mxu1 %v2733_v59 }
  0x28   :  { %1888 = vmatprep.subr.bf16.mxu0 %v2633_v42  ;;  %2099 = vmatprep.subr.mxu1 %v2354_v57 }
  0x29   :  { %2100 = vmatpush3.msra.mxu1 %v2739_v60 }
  0x2a   :  { %2101 = vmatprep.subr.mxu1 %v2354_v57 }
  0x2b   :  { %1889 = vmatpush3.bf16.msra.mxu0 %v2639_v43  ;;  %2102 = vmatpush3.msra.mxu1 %v2746_v61 }
  0x2c   :  { %1890 = vmatprep.subr.bf16.mxu0 %v2645_v44  ;;  %2103 = vmatprep.subr.mxu1 %v2354_v57 }
  0x2d   :  { %2104 = vmatpush3.msra.mxu1 %v2753_v62 }
  0x2e   :  { %2105 = vmatprep.subr.mxu1 %v2354_v57 }
  0x2f   :  { %1891 = vmatpush3.bf16.msra.mxu0 %v2651_v45  ;;  %2106 = vmatpush3.msra.mxu1 %v2760_v63 }
  0x30   :  { %1892 = vmatprep.subr.bf16.mxu0 %v2657_v46  ;;  %2107 = vmatprep.subr.mxu1 %v2354_v57 }
  0x31   :  { %2108 = vmatpush3.msra.mxu1 %v2767_v31 }
  0x32   :  { %2109 = vmatprep.subr.mxu1 %v2354_v57 }
  0x33   :  { %1893 = vmatpush3.bf16.msra.mxu0 %v2663_v47  ;;  %2110 = vmatpush3.msra.mxu1 %v2774_v32 }
  0x34   :  { %1894 = vmatprep.subr.bf16.mxu0 %v2672_v49  ;;  %2111 = vmatprep.subr.mxu1 %v2354_v57 }
  0x35   :  { %2112 = vmatpush3.msra.mxu1 %v2781_v33 }
  0x36   :  { %2113 = vmatprep.subr.mxu1 %v2354_v57 }
  0x37   :  { %1895 = vmatpush3.bf16.msra.mxu0 %v2678_v51  ;;  %2114 = vmatpush3.msra.mxu1 %v2788_v36  ;;  %v1812_v36 = vcombine.low %v658_v50, %v658_v50 }
  0x38   :  { %1896 = vmatprep.subr.bf16.mxu0 %v2684_v52  ;;  %2115 = vmatprep.subr.mxu1 %v2354_v57 }
  0x39   :  { %2116 = vmatpush3.msra.mxu1 %v2795_v37  ;;  %v1813_v37 = vcombine.high %v658_v50, %v658_v50 }
  0x3a   :  { %2117 = vmatprep.subr.mxu1 %v2354_v57 }
  0x3b   :  { %1897 = vmatpush3.bf16.msra.mxu0 %v2690_v53  ;;  %2118 = vmatpush3.msra.mxu1 %v2802_v38 }
  0x3c   :  { %1898 = vmatprep.subr.bf16.mxu0 %v2696_v54  ;;  %2119 = vmatprep.subr.mxu1 %v2354_v57 }
  0x3d   :  { %2120 = vmatpush3.msra.mxu1 %v2809_v48  ;;  %v2828_v48 = vld [vmem:[%s3234_s5 + $0x8] sm:$0xff] }
  0x3e   :  { %2121 = vmatprep.subr.mxu1 %v2354_v57 }
  0x3f   :  { %1899 = vmatpush3.bf16.msra.mxu0 %v2702_v55 }
  0x40   :  { %1923 = vmatprep.subr.bf16.mxu0 %v2412_v0 }
  0x42   :  { %575 = vmatmul.mubr.bf16.vlgmr.msra.gmra.mxu0 %v1761_v56  ;;  %v2821_v56 = vld [vmem:[%s3234_s5 + $0x10] sm:$0xff] }
  0x43   :  { %1924 = vmatpush3.bf16.msra.mxu0 %v2417_v1  ;;  %3252 = vst [vmem:[#allocation5_spill] sm:$0xff] %v2821_v56  ;;  %2122 = vmatpush3.msra.mxu1 %v2821_v56  ;;  %v2836_v56 = vld [vmem:[%s3234_s5] sm:$0xff] }
  0x44   :  { %1925 = vmatprep.subr.bf16.mxu0 %v2435_v4  ;;  %2123 = vmatprep.subr.mxu1 %v2354_v57 }
  0x45   :  { %714 = vmatprep.mubr.bf16.mxu0 %v1813_v37  ;;  %2124 = vmatpush3.msra.mxu1 %v2828_v48 }
  0x46   :  { %2125 = vmatprep.subr.mxu1 %v2354_v57 }
  0x47   :  { %1926 = vmatpush3.bf16.msra.mxu0 %v2441_v5  ;;  %2126 = vmatpush3.msra.mxu1 %v2836_v56 }
  0x48   :  { %1927 = vmatprep.subr.bf16.mxu0 %v2459_v8  ;;  %1945 = vmatprep.subr.bf16.mxu1 %v2423_v2 }
  0x4b   :  { %1928 = vmatpush3.bf16.msra.mxu0 %v2465_v9 }
  0x4c   :  { %1929 = vmatprep.subr.bf16.mxu0 %v2483_v12 }
  0x4f   :  { %1930 = vmatpush3.bf16.msra.mxu0 %v2489_v13 }
  0x50   :  { %1931 = vmatprep.subr.bf16.mxu0 %v2507_v16 }
  0x53   :  { %1932 = vmatpush3.bf16.msra.mxu0 %v2513_v17 }
  0x54   :  { %1933 = vmatprep.subr.bf16.mxu0 %v2531_v20 }
  0x57   :  { %1934 = vmatpush3.bf16.msra.mxu0 %v2537_v21 }
  0x58   :  { %1935 = vmatprep.subr.bf16.mxu0 %v2555_v24 }
  0x5b   :  { %1936 = vmatpush3.bf16.msra.mxu0 %v2561_v25 }
  0x5c   :  { %1937 = vmatprep.subr.bf16.mxu0 %v2579_v28 }
  0x5f   :  { %1938 = vmatpush3.bf16.msra.mxu0 %v2585_v29 }
  0x60   :  { %1967 = vmatprep.subr.bf16.mxu0 %v2606_v35 }
  0x62   :  { %715 = vmatmul.mubr.bf16.vlgmr.msra.gmra.mxu0 %v1812_v36  ;;  %v660_v36 = vld [vmem:[%s3235_s1 + $0x10] sm:$0xff] }
  0x63   :  { %1968 = vmatpush3.bf16.msra.mxu0 %v2615_v39  ;;  %v1816_v37 = vcombine.low %v660_v36, %v660_v36  ;;  %v1817_v50 = vcombine.high %v660_v36, %v660_v36 }
  0x64   :  { %1969 = vmatprep.subr.bf16.mxu0 %v2621_v40 }
  0x65   :  { %794 = vmatprep.mubr.bf16.mxu0 %v1817_v50 }
  0x67   :  { %1970 = vmatpush3.bf16.msra.mxu0 %v2627_v41 }
  0x68   :  { %1971 = vmatprep.subr.bf16.mxu0 %v2633_v42 }
  0x6b   :  { %1972 = vmatpush3.bf16.msra.mxu0 %v2639_v43 }
  0x6c   :  { %1973 = vmatprep.subr.bf16.mxu0 %v2645_v44 }
  0x6f   :  { %1974 = vmatpush3.bf16.msra.mxu0 %v2651_v45 }
  0x70   :  { %1975 = vmatprep.subr.bf16.mxu0 %v2657_v46 }
  0x73   :  { %1976 = vmatpush3.bf16.msra.mxu0 %v2663_v47 }
  0x74   :  { %1977 = vmatprep.subr.bf16.mxu0 %v2672_v49 }
  0x77   :  { %1978 = vmatpush3.bf16.msra.mxu0 %v2678_v51 }
  0x78   :  { %1979 = vmatprep.subr.bf16.mxu0 %v2684_v52 }
  0x7b   :  { %1980 = vmatpush3.bf16.msra.mxu0 %v2690_v53 }
  0x7c   :  { %1981 = vmatprep.subr.bf16.mxu0 %v2696_v54 }
  0x7f   :  { %1982 = vmatpush3.bf16.msra.mxu0 %v2702_v55 }
  0x80   :  { %2006 = vmatprep.subr.bf16.mxu0 %v2412_v0 }
  0x82   :  { %795 = vmatmul.mubr.bf16.vlgmr.msra.gmra.mxu0 %v1816_v37 }
  0x83   :  { %2007 = vmatpush3.bf16.msra.mxu0 %v2417_v1 }
  0x84   :  { %2008 = vmatprep.subr.bf16.mxu0 %v2435_v4 }
  0x87   :  { %2009 = vmatpush3.bf16.msra.mxu0 %v2441_v5 }
  0x88   :  { %2010 = vmatprep.subr.bf16.mxu0 %v2459_v8 }
  0x8b   :  { %2011 = vmatpush3.bf16.msra.mxu0 %v2465_v9 }
  0x8c   :  { %2012 = vmatprep.subr.bf16.mxu0 %v2483_v12 }
  0x8f   :  { %2013 = vmatpush3.bf16.msra.mxu0 %v2489_v13 }
  0x90   :  { %2014 = vmatprep.subr.bf16.mxu0 %v2507_v16 }
  0x93   :  { %2015 = vmatpush3.bf16.msra.mxu0 %v2513_v17  ;;  %v2879_v17 = vld [vmem:[%s3236_s4] ss:$0 sm:$0xff] }
  0x94   :  { %2016 = vmatprep.subr.bf16.mxu0 %v2531_v20 }
  0x97   :  { %2017 = vmatpush3.bf16.msra.mxu0 %v2537_v21 }
  0x98   :  { %2018 = vmatprep.subr.bf16.mxu0 %v2555_v24 }
  0x9b   :  { %2019 = vmatpush3.bf16.msra.mxu0 %v2561_v25  ;;  %v659_v25 = vld [vmem:[%s3235_s1 + $0x8] sm:$0xff] }
  0x9c   :  { %2020 = vmatprep.subr.bf16.mxu0 %v2579_v28  ;;  %v1815_v37 = vcombine.high %v659_v25, %v659_v25 }
  0x9f   :  { %2021 = vmatpush3.bf16.msra.mxu0 %v2585_v29 }
  0xa0   :  { %2050 = vmatprep.subr.bf16.mxu0 %v2606_v35 }
  0xe2   :  { %v1856_v0 = vpop.f32.mrf.mxu0 }
  0xe4   :  { %v1857_v1 = vpop.f32.mrf.mxu0  ;;  %v1878_v4 = vpop.f32.mrf.mxu1 }
  0xe5   :  { %v1858_v16 = vadd.f32 %v1857_v1, %v1856_v0  ;;  %v1814_v1 = vcombine.low %v659_v25, %v659_v25 }
  0xe6   :  { %v1859_v5 = vpop.f32.mrf.mxu0  ;;  %v1879_v8 = vpop.f32.mrf.mxu1 }
  0xe7   :  { %v497_v20 = vadd.f32 %v1858_v16, %v2879_v17  ;;  %v1880_v21 = vadd.f32 %v1879_v8, %v1878_v4  ;;  %v3253_v4 = vld [vmem:[#allocation2_spill] sm:$0xff]  ;;  %v3254_v5 = vld [vmem:[#allocation3_spill] sm:$0xff]  ;;  %v3255_v8 = vld [vmem:[#allocation4_spill] sm:$0xff] }
  0xe8   :  { %v1860_v9 = vpop.f32.mrf.mxu0  ;;  %v1881_v12 = vpop.f32.mrf.mxu1 }
  0xe9   :  { %v537_v29 = vadd.f32 %v1880_v21, %v497_v20  ;;  %v3256_v9 = vld [vmem:[#allocation5_spill] sm:$0xff] }
  0xea   :  { %v1882_v13 = vpop.f32.mrf.mxu1 }
 0x102   :  { %v1900_v24 = vpop.f32.mrf.mxu0 }
 0x104   :  { %v1901_v28 = vpop.f32.mrf.mxu0 }
 0x105   :  { %v1902_v35 = vadd.f32 %v1901_v28, %v1900_v24 }
 0x106   :  { %v1903_v36 = vpop.f32.mrf.mxu0 }
 0x107   :  { %v2885_v50 = vadd.f32 %v1902_v35, %v537_v29  ;;  %v872_v35 = vld [vmem:[%s3237_s2] sm:$0xff] }
 0x108   :  { %v1904_v0 = vpop.f32.mrf.mxu0 }
 0x109   :  { %2128 = vmatmul.mubr.f32.vlgmr.msra.gmra.mxu1 %v2885_v50  ;;  %v1818_v0 = vcombine.low %v872_v35, %v872_v35 }
 0x10a   :  { %1946 = vmatpush3.bf16.msra.mxu1 %v2429_v3  ;;  %754 = vmatprep.mubr.bf16.mxu1 %v1815_v37  ;;  %v1819_v37 = vcombine.high %v872_v35, %v872_v35 }
 0x10b   :  { %1947 = vmatprep.subr.bf16.mxu1 %v2447_v6 }
 0x10c   :  { %928 = vmatprep.mubr.bf16.mxu0 %v1819_v37 }
 0x10d   :  { %929 = vmatmul.mubr.bf16.vlgmr.msra.gmra.mxu0 %v1818_v0 }
 0x10e   :  { %1948 = vmatpush3.bf16.msra.mxu1 %v2453_v7  ;;  %2051 = vmatpush3.bf16.msra.mxu0 %v2615_v39 }
 0x10f   :  { %1949 = vmatprep.subr.bf16.mxu1 %v2471_v10  ;;  %2052 = vmatprep.subr.bf16.mxu0 %v2621_v40 }
 0x112   :  { %1950 = vmatpush3.bf16.msra.mxu1 %v2477_v11  ;;  %2053 = vmatpush3.bf16.msra.mxu0 %v2627_v41 }
 0x113   :  { %1951 = vmatprep.subr.bf16.mxu1 %v2495_v14  ;;  %2054 = vmatprep.subr.bf16.mxu0 %v2633_v42 }
 0x116   :  { %1952 = vmatpush3.bf16.msra.mxu1 %v2501_v15  ;;  %2055 = vmatpush3.bf16.msra.mxu0 %v2639_v43 }
 0x117   :  { %1953 = vmatprep.subr.bf16.mxu1 %v2519_v18  ;;  %2056 = vmatprep.subr.bf16.mxu0 %v2645_v44 }
 0x11a   :  { %1954 = vmatpush3.bf16.msra.mxu1 %v2525_v19  ;;  %2057 = vmatpush3.bf16.msra.mxu0 %v2651_v45 }
 0x11b   :  { %1955 = vmatprep.subr.bf16.mxu1 %v2543_v22  ;;  %2058 = vmatprep.subr.bf16.mxu0 %v2657_v46 }
 0x11e   :  { %1956 = vmatpush3.bf16.msra.mxu1 %v2549_v23  ;;  %2059 = vmatpush3.bf16.msra.mxu0 %v2663_v47  ;;  %v873_v47 = vld [vmem:[%s3237_s2 + $0x8] sm:$0xff] }
 0x11f   :  { %1957 = vmatprep.subr.bf16.mxu1 %v2567_v26  ;;  %2060 = vmatprep.subr.bf16.mxu0 %v2672_v49 }
 0x122   :  { %1958 = vmatpush3.bf16.msra.mxu1 %v2573_v27  ;;  %v1939_v12 = vpop.f32.mrf.mxu0  ;;  %2061 = vmatpush3.bf16.msra.mxu0 %v2678_v51 }
 0x123   :  { %1959 = vmatprep.subr.bf16.mxu1 %v2591_v30  ;;  %2062 = vmatprep.subr.bf16.mxu0 %v2684_v52 }
 0x124   :  { %v1940_v13 = vpop.f32.mrf.mxu0 }
 0x125   :  { %v1941_v16 = vadd.f32 %v1940_v13, %v1939_v12 }
 0x126   :  { %1960 = vmatpush3.bf16.msra.mxu1 %v2601_v34  ;;  %v1942_v20 = vpop.f32.mrf.mxu0  ;;  %2063 = vmatpush3.bf16.msra.mxu0 %v2690_v53  ;;  %v1821_v53 = vcombine.high %v873_v47, %v873_v47 }
 0x127   :  { %2130 = vmatprep.subr.mxu1 %v2354_v57  ;;  %2064 = vmatprep.subr.bf16.mxu0 %v2696_v54  ;;  %v717_v45 = vadd.f32 %v1941_v16, %v2879_v17 }
 0x128   :  { %v1943_v21 = vpop.f32.mrf.mxu0 }
 0x129   :  { %755 = vmatmul.mubr.bf16.vlgmr.msra.gmra.mxu1 %v1814_v1 }
 0x12a   :  { %2131 = vmatpush3.msra.mxu1 %v2727_v58  ;;  %2162 = vmatprep.mubr.msk.f32.mxu1 %vm2355_vm0, %v2354_v57 }
 0x12b   :  { %2132 = vmatprep.subr.mxu1 %v2354_v57  ;;  %2065 = vmatpush3.bf16.msra.mxu0 %v2702_v55 }
 0x12c   :  { %2133 = vmatpush3.msra.mxu1 %v2733_v59  ;;  %2205 = vmatprep.subr.mxu0 %v2354_v57 }
 0x12d   :  { %2134 = vmatprep.subr.mxu1 %v2354_v57 }
 0x12e   :  { %2135 = vmatpush3.msra.mxu1 %v2739_v60 }
 0x12f   :  { %2136 = vmatprep.subr.mxu1 %v2354_v57 }
 0x130   :  { %2137 = vmatpush3.msra.mxu1 %v2746_v61 }
 0x131   :  { %2138 = vmatprep.subr.mxu1 %v2354_v57 }
 0x132   :  { %2139 = vmatpush3.msra.mxu1 %v2753_v62 }
 0x133   :  { %2140 = vmatprep.subr.mxu1 %v2354_v57 }
 0x134   :  { %2141 = vmatpush3.msra.mxu1 %v2760_v63 }
 0x135   :  { %2142 = vmatprep.subr.mxu1 %v2354_v57 }
 0x136   :  { %2143 = vmatpush3.msra.mxu1 %v2767_v31 }
 0x137   :  { %2144 = vmatprep.subr.mxu1 %v2354_v57 }
 0x138   :  { %2145 = vmatpush3.msra.mxu1 %v2774_v32 }
 0x139   :  { %2146 = vmatprep.subr.mxu1 %v2354_v57 }
 0x13a   :  { %2147 = vmatpush3.msra.mxu1 %v2781_v33 }
 0x13b   :  { %2148 = vmatprep.subr.mxu1 %v2354_v57 }
 0x13c   :  { %2149 = vmatpush3.msra.mxu1 %v3253_v4 }
 0x13d   :  { %2150 = vmatprep.subr.mxu1 %v2354_v57 }
 0x13e   :  { %2151 = vmatpush3.msra.mxu1 %v3254_v5 }
 0x13f   :  { %2152 = vmatprep.subr.mxu1 %v2354_v57 }
 0x140   :  { %2153 = vmatpush3.msra.mxu1 %v2802_v38 }
 0x141   :  { %2154 = vmatprep.subr.mxu1 %v2354_v57 }
 0x142   :  { %2155 = vmatpush3.msra.mxu1 %v3255_v8  ;;  %v1983_v24 = vpop.f32.mrf.mxu0 }
 0x143   :  { %2156 = vmatprep.subr.mxu1 %v2354_v57 }
 0x144   :  { %2157 = vmatpush3.msra.mxu1 %v3256_v9  ;;  %v1984_v25 = vpop.f32.mrf.mxu0 }
 0x145   :  { %2158 = vmatprep.subr.mxu1 %v2354_v57  ;;  %v1985_v28 = vadd.f32 %v1984_v25, %v1983_v24  ;;  %v2357_v24 = vmov 1  }
 0x146   :  { %2159 = vmatpush3.msra.mxu1 %v2828_v48  ;;  %v1986_v29 = vpop.f32.mrf.mxu0 }
 0x147   :  { %2160 = vmatprep.subr.mxu1 %v2354_v57 }
 0x148   :  { %2161 = vmatpush3.msra.mxu1 %v2836_v56  ;;  %v1987_v36 = vpop.f32.mrf.mxu0 }
 0x149   :  { %2028 = vmatprep.subr.bf16.mxu1 %v2423_v2  ;;  %v874_v2 = vld [vmem:[%s3237_s2 + $0x10] sm:$0xff] }
 0x14a   :  { %v1822_v39 = vcombine.low %v874_v2, %v874_v2  ;;  %v1823_v40 = vcombine.high %v874_v2, %v874_v2 }
 0x14c   :  { %1008 = vmatprep.mubr.bf16.mxu0 %v1823_v40 }
 0x14d   :  { %1009 = vmatmul.mubr.bf16.vlgmr.msra.gmra.mxu0 %v1822_v39 }
 0x14e   :  { %2207 = vmatprep.mubr.msk.f32.mxu0 %vm2355_vm0, %v2354_v57 }
 0x1c9   :  { %v2962_v41 = vpop.f32.mrf.mxu1 }
 0x1cb   :  { %v2129_v42 = vpop.f32.mrf.mxu1 }
 0x1e9   :  { %v1961_v43 = vpop.f32.mrf.mxu1 }
 0x1eb   :  { %v1962_v44 = vpop.f32.mrf.mxu1 }
 0x1ec   :  { %v1963_v46 = vadd.f32 %v1962_v44, %v1961_v43  ;;  %v2358_v43 = vmov 2  }
 0x1ed   :  { %v1964_v49 = vpop.f32.mrf.mxu1 }
 0x1ee   :  { %v757_v51 = vadd.f32 %v1963_v46, %v717_v45 }
 0x1ef   :  { %v1965_v52 = vpop.f32.mrf.mxu1 }
 0x1f0   :  { %v2968_v54 = vadd.f32 %v1985_v28, %v757_v51 }
 0x1f2   :  { %2163 = vmatmul.mubr.f32.vlgmr.msra.gmra.mxu1 %v2968_v54  ;;  %v1176_v55 = vmul.f32 %v2968_v54, %v2968_v54 }
 0x1f3   :  { %2029 = vmatpush3.bf16.msra.mxu1 %v2429_v3  ;;  %968 = vmatprep.mubr.bf16.mxu1 %v1821_v53  ;;  %v1820_v3 = vcombine.low %v873_v47, %v873_v47 }
 0x1f4   :  { %1177 = vadd.xlane.f32.xlu0 %v1176_v55  ;;  %2030 = vmatprep.subr.bf16.mxu1 %v2447_v6  ;;  %v2022_v6 = vpop.f32.mrf.mxu0 }
 0x1f7   :  { %2031 = vmatpush3.bf16.msra.mxu1 %v2453_v7  ;;  %v2023_v7 = vpop.f32.mrf.mxu0 }
 0x1f8   :  { %2032 = vmatprep.subr.bf16.mxu1 %v2471_v10  ;;  %v2024_v10 = vadd.f32 %v2023_v7, %v2022_v6  ;;  %v2359_v6 = vmov 3   ;;  %v3072_v7 = vld [vmem:[%s3238_s6] ss:$0 sm:$0xff] }
 0x1fb   :  { %2033 = vmatpush3.bf16.msra.mxu1 %v2477_v11  ;;  %v2025_v11 = vpop.f32.mrf.mxu0 }
 0x1fc   :  { %2034 = vmatprep.subr.bf16.mxu1 %v2495_v14 }
 0x1fd   :  { %v2026_v14 = vpop.f32.mrf.mxu0 }
 0x1ff   :  { %2035 = vmatpush3.bf16.msra.mxu1 %v2501_v15 }
 0x200   :  { %2036 = vmatprep.subr.bf16.mxu1 %v2519_v18 }
 0x203   :  { %2037 = vmatpush3.bf16.msra.mxu1 %v2525_v19 }
 0x204   :  { %2038 = vmatprep.subr.bf16.mxu1 %v2543_v22 }
 0x207   :  { %2039 = vmatpush3.bf16.msra.mxu1 %v2549_v23 }
 0x208   :  { %2040 = vmatprep.subr.bf16.mxu1 %v2567_v26 }
 0x20b   :  { %2041 = vmatpush3.bf16.msra.mxu1 %v2573_v27 }
 0x20c   :  { %2042 = vmatprep.subr.bf16.mxu1 %v2591_v30 }
 0x20d   :  { %v2066_v15 = vpop.f32.mrf.mxu0 }
 0x20f   :  { %2043 = vmatpush3.bf16.msra.mxu1 %v2601_v34  ;;  %v2067_v18 = vpop.f32.mrf.mxu0 }
 0x210   :  { %2165 = vmatprep.subr.mxu1 %v2354_v57  ;;  %v2068_v19 = vadd.f32 %v2067_v18, %v2066_v15 }
 0x211   :  { %v2069_v22 = vpop.f32.mrf.mxu0 }
 0x212   :  { %969 = vmatmul.mubr.bf16.vlgmr.msra.gmra.mxu1 %v1820_v3 }
 0x213   :  { %2166 = vmatpush3.msra.mxu1 %v2727_v58  ;;  %2197 = vmatprep.mubr.msk.f32.mxu1 %vm2355_vm0, %v2354_v57  ;;  %v2070_v23 = vpop.f32.mrf.mxu0 }
 0x214   :  { %2167 = vmatprep.subr.mxu1 %v2354_v57 }
 0x215   :  { %2168 = vmatpush3.msra.mxu1 %v2733_v59 }
 0x216   :  { %2169 = vmatprep.subr.mxu1 %v2354_v57 }
 0x217   :  { %2170 = vmatpush3.msra.mxu1 %v2739_v60 }
 0x218   :  { %2171 = vmatprep.subr.mxu1 %v2354_v57 }
 0x219   :  { %2172 = vmatpush3.msra.mxu1 %v2746_v61 }
 0x21a   :  { %2173 = vmatprep.subr.mxu1 %v2354_v57 }
 0x21b   :  { %2174 = vmatpush3.msra.mxu1 %v2753_v62  ;;  %v931_v62 = vadd.f32 %v2024_v10, %v2879_v17 }
 0x21c   :  { %2175 = vmatprep.subr.mxu1 %v2354_v57 }
 0x21d   :  { %2176 = vmatpush3.msra.mxu1 %v2760_v63 }
 0x21e   :  { %2177 = vmatprep.subr.mxu1 %v2354_v57 }
 0x21f   :  { %2178 = vmatpush3.msra.mxu1 %v2767_v31 }
 0x220   :  { %2179 = vmatprep.subr.mxu1 %v2354_v57 }
 0x221   :  { %2180 = vmatpush3.msra.mxu1 %v2774_v32 }
 0x222   :  { %2181 = vmatprep.subr.mxu1 %v2354_v57 }
 0x223   :  { %2182 = vmatpush3.msra.mxu1 %v2781_v33 }
 0x224   :  { %2183 = vmatprep.subr.mxu1 %v2354_v57 }
 0x225   :  { %2184 = vmatpush3.msra.mxu1 %v3253_v4 }
 0x226   :  { %2185 = vmatprep.subr.mxu1 %v2354_v57 }
 0x227   :  { %2186 = vmatpush3.msra.mxu1 %v3254_v5 }
 0x228   :  { %2187 = vmatprep.subr.mxu1 %v2354_v57 }
 0x229   :  { %2188 = vmatpush3.msra.mxu1 %v2802_v38 }
 0x22a   :  { %2189 = vmatprep.subr.mxu1 %v2354_v57 }
 0x22b   :  { %2190 = vmatpush3.msra.mxu1 %v3255_v8 }
 0x22c   :  { %2191 = vmatprep.subr.mxu1 %v2354_v57 }
 0x22d   :  { %2192 = vmatpush3.msra.mxu1 %v3256_v9 }
 0x22e   :  { %2193 = vmatprep.subr.mxu1 %v2354_v57 }
 0x22f   :  { %2194 = vmatpush3.msra.mxu1 %v2828_v48  ;;  %v2356_v48 = vmov 0  }
 0x230   :  { %2195 = vmatprep.subr.mxu1 %v2354_v57  ;;  %2226 = vset.pattern.permute.xlu1 %v2356_v48 }
 0x231   :  { %2196 = vmatpush3.msra.mxu1 %v2836_v56  ;;  %2225 = vset.pattern.permute.xlu0 %v2356_v48  ;;  %v1086_v56 = vlaneseq }
 0x232   :  { %2200 = vmatprep.subr.mxu1 %v2354_v57 }
 0x233   :  { %v3032_v17 = vshrl.u32 %v1086_v56, 7  ;;  %v3034_v1 = vand.u32 127, %v1086_v56 }
 0x235   :  { %vm1328_vm1 = vcmp.eq.s32.totalorder %v3032_v17, %v3034_v1  ;;  %v1354_v25 = vsub.s32 0, %v3032_v17  ;;  %vm1344_vm2 = vcmp.eq.s32.totalorder %v3032_v17, 0  ;;  %v1387_v44 = vsub.s32 1, %v3032_v17 }
 0x236   :  { %v1828_v5 = vsel %vm1328_vm1, 1.0, %v2354_v57  ;;  %v3051_v37 = vsel %vm1344_vm2, 1.0, %v2354_v57  ;;  %vm1377_vm3 = vcmp.eq.s32.totalorder %v3032_v17, 1  ;;  %vm1088_vm4 = vcmp.lt.s32.totalorder %v3034_v1, 2 }
 0x237   :  { %v1331_v9 = vmul.f32 0.001, %v1828_v5  ;;  %v3063_v49 = vsel %vm1377_vm3, 1.0, %v2354_v57  ;;  %v1420_v14 = vsub.s32 2, %v3032_v17  ;;  %vm1410_vm5 = vcmp.eq.s32.totalorder %v3032_v17, 2 }
 0x238   :  { %v3090_v22 = vsel %vm1410_vm5, 1.0, %v2354_v57  ;;  %vm1443_vm6 = vcmp.eq.s32.totalorder %v3032_v17, 3  ;;  %vm1476_vm7 = vcmp.eq.s32.totalorder %v3032_v17, 4  ;;  %vm1509_vm9 = vcmp.eq.s32.totalorder %v3032_v17, 5 }
 0x239   :  { %v3105_v48 = vsel %vm1443_vm6, 1.0, %v2354_v57  ;;  %vm1542_vm12 = vcmp.eq.s32.totalorder %v3032_v17, 6  ;;  %vm1574_vm13 = vcmp.eq.s32.totalorder %v3032_v17, 7 }
 0x27d   :  { %v1178_v26 = vpop.xlane.xlu0 %1177 }
 0x27e   :  { %v1179_v27 = vadd.f32 1e-12, %v1178_v26 }
 0x280   :  { %2304 = vrsqrt.f32 %v1179_v27 }
 0x28d   :  { %v2305_v30 = vpop.eup %2304 }
 0x28e   :  { %v1181_v34 = vmul.f32 %v2305_v30, %v2968_v54 }
 0x290   :  { %2206 = vmatpush3.xpose.msra.mxu0 %v1181_v34 }
 0x2b2   :  { %v3024_v58 = vpop.f32.mrf.mxu1 }
 0x2b3   :  { %v869_v10 = vadd.f32 %v3072_v7, %v3024_v58 }
 0x2b4   :  { %v2164_v59 = vpop.f32.mrf.mxu1 }
 0x2b5   :  { %v3079_v11 = vsel %vm1088_vm4, %v869_v10, -1e+30  ;;  %v2360_v59 = vmov 4  }
 0x2d2   :  { %v2044_v60 = vpop.f32.mrf.mxu1 }
 0x2d4   :  { %v2045_v61 = vpop.f32.mrf.mxu1 }
 0x2d5   :  { %v2046_v63 = vadd.f32 %v2045_v61, %v2044_v60 }
 0x2d6   :  { %v2047_v31 = vpop.f32.mrf.mxu1 }
 0x2d7   :  { %v971_v32 = vadd.f32 %v2046_v63, %v931_v62  ;;  %v1453_v31 = vsub.s32 3, %v3032_v17 }
 0x2d8   :  { %v2048_v33 = vpop.f32.mrf.mxu1 }
 0x2d9   :  { %v1011_v38 = vadd.f32 %v2068_v19, %v971_v32 }
 0x2db   :  { %2198 = vmatmul.mubr.f32.vlgmr.msra.gmra.mxu1 %v1011_v38 }
 0x2dc   :  { %2201 = vmatpush3.xpose.msra.mxu1 %v1181_v34  ;;  %2202 = vmatprep.mubr.msk.f32.mxu1 %vm2355_vm0, %v2354_v57 }
 0x2dd   :  { %2210 = vmatprep.subr.mxu1 %v2354_v57 }
 0x2df   :  { %2203 = vmatmul.mubr.f32.vlgmr.msra.gmra.mxu1 %v1181_v34 }
 0x2e0   :  { %2212 = vmatprep.mubr.msk.f32.mxu1 %vm2355_vm0, %v2354_v57 }
 0x39b   :  { %v3038_v4 = vpop.f32.mrf.mxu1 }
 0x39d   :  { %v2199_v8 = vpop.f32.mrf.mxu1 }
 0x39f   :  { %v1248_v12 = vpop.f32.mrf.mxu1 }
 0x3a0   :  { %v1826_v13 = vclamps-f32 %v1248_v12, 1.0 }
 0x3a1   :  { %v2204_v16 = vpop.f32.mrf.mxu1 }
 0x3a2   :  { %v1332_v20 = vadd.f32 %v1826_v13, %v1331_v9  ;;  %v2361_v16 = vmov 5  }
 0x3a4   :  { %2306 = vrcp.f32 %v1332_v20  ;;  %1349 = vperm.xlu1 %2226, %v1332_v20  }
 0x3a8   :  { %2227 = vset.pattern.permute.xlu1 %v2357_v24 }
 0x3b1   :  { %v2307_v21 = vpop.eup %2306 }
 0x3b2   :  { %1339 = vperm.xlu0 %2225, %v2307_v21  }
 0x3b6   :  { %2229 = vset.pattern.permute.xlu0 %v2359_v6 }
 0x41f   :  { %v3048_v36 = vpop.permute.xlu1 %1349 }
 0x42d   :  { %v3042_v28 = vpop.permute.xlu0 %1339 }
 0x42e   :  { %v1342_v29 = vmul.f32 %v3042_v28, %v1332_v20 }
 0x430   :  { %v1355_v35 = vrot.slane %v1342_v29, %v1354_v25 }
 0x432   :  { %v1356_v0 = vmul.f32 %v1355_v35, %v3048_v36  ;;  %v1358_v39 = vmul.f32 %v3051_v37, %v1355_v35  ;;  %v1486_v35 = vsub.s32 4, %v3032_v17 }
 0x434   :  { %v1357_v2 = vsub.f32 %v1332_v20, %v1356_v0  ;;  %v1170_v20 = vmul.f32 %v2885_v50, %v2885_v50 }
 0x436   :  { %v1359_v40 = vadd.f32 %v1358_v39, %v1357_v2 }
 0x438   :  { %2308 = vrcp.f32 %v1359_v40 }
 0x445   :  { %v2309_v42 = vpop.eup %2308 }
 0x446   :  { %1372 = vperm.xlu1 %2227, %v2309_v42   ;;  %v3123_v42 = vsel %vm1476_vm7, 1.0, %v2354_v57 }
 0x44a   :  { %1382 = vperm.xlu1 %2227, %v1359_v40  }
 0x44e   :  { %2228 = vset.pattern.permute.xlu1 %v2358_v43 }
 0x4c1   :  { %v3056_v45 = vpop.permute.xlu1 %1372 }
 0x4c2   :  { %v1375_v46 = vmul.f32 %v3056_v45, %v1359_v40 }
 0x4c4   :  { %v1388_v47 = vrot.slane %v1375_v46, %v1387_v44 }
 0x4c5   :  { %v3065_v51 = vpop.permute.xlu1 %1382 }
 0x4c6   :  { %v1389_v52 = vmul.f32 %v1388_v47, %v3065_v51  ;;  %v1391_v53 = vmul.f32 %v3063_v49, %v1388_v47 }
 0x4c8   :  { %v1390_v54 = vsub.f32 %v1359_v40, %v1389_v52 }
 0x4ca   :  { %v1392_v55 = vadd.f32 %v1391_v53, %v1390_v54  ;;  %v2362_v54 = vmov 6  }
 0x4cc   :  { %2310 = vrcp.f32 %v1392_v55 }
 0x4d9   :  { %v2311_v3 = vpop.eup %2310 }
 0x4da   :  { %1405 = vperm.xlu1 %2228, %v2311_v3  }
 0x4de   :  { %1415 = vperm.xlu1 %2228, %v1392_v55  }
 0x4e2   :  { %2230 = vset.pattern.permute.xlu1 %v2360_v59 }
 0x502   :  { %1090 = vmax.xlane.f32.xlu1 %v3079_v11 }
 0x555   :  { %v3083_v15 = vpop.permute.xlu1 %1405 }
 0x556   :  { %v1408_v18 = vmul.f32 %v3083_v15, %v1392_v55 }
 0x558   :  { %v1421_v19 = vrot.slane %v1408_v18, %v1420_v14 }
 0x559   :  { %v3092_v23 = vpop.permute.xlu1 %1415 }
 0x55a   :  { %v1422_v26 = vmul.f32 %v1421_v19, %v3092_v23  ;;  %v1424_v27 = vmul.f32 %v3090_v22, %v1421_v19 }
 0x55c   :  { %v1423_v30 = vsub.f32 %v1392_v55, %v1422_v26 }
 0x55e   :  { %v1425_v34 = vadd.f32 %v1424_v27, %v1423_v30  ;;  %v1519_v30 = vsub.s32 5, %v3032_v17 }
 0x560   :  { %2312 = vrcp.f32 %v1425_v34 }
 0x56d   :  { %v2313_v58 = vpop.eup %2312 }
 0x56e   :  { %1438 = vperm.xlu0 %2229, %v2313_v58  }
 0x572   :  { %1448 = vperm.xlu0 %2229, %v1425_v34  }
 0x576   :  { %2231 = vset.pattern.permute.xlu0 %v2360_v59 }
 0x58b   :  { %v1091_v60 = vpop.xlane.xlu1 %1090 }
 0x58c   :  { %v1092_v61 = vsub.f32 %v3079_v11, %v1091_v60  ;;  %v3142_v60 = vsel %vm1509_vm9, 1.0, %v2354_v57 }
 0x58e   :  { %v1093_v62 = vmul.f32 1.442695, %v1092_v61 }
 0x590   :  { %2314 = vpow2.f32 %v1093_v62 }
 0x59d   :  { %v2315_v63 = vpop.eup %2314 }
 0x59e   :  { %1095 = vadd.xlane.f32.xlu1 %v2315_v63 }
 0x5e9   :  { %v3098_v32 = vpop.permute.xlu0 %1438 }
 0x5ea   :  { %v1441_v33 = vmul.f32 %v3098_v32, %v1425_v34 }
 0x5ec   :  { %v1454_v38 = vrot.slane %v1441_v33, %v1453_v31 }
 0x5ed   :  { %v3107_v56 = vpop.permute.xlu0 %1448 }
 0x5ee   :  { %v1455_v5 = vmul.f32 %v1454_v38, %v3107_v56  ;;  %v1457_v8 = vmul.f32 %v3105_v48, %v1454_v38 }
 0x5f0   :  { %v1456_v9 = vsub.f32 %v1425_v34, %v1455_v5 }
 0x5f2   :  { %v1458_v12 = vadd.f32 %v1457_v8, %v1456_v9 }
 0x5f4   :  { %2316 = vrcp.f32 %v1458_v12  ;;  %1481 = vperm.xlu1 %2230, %v1458_v12  }
 0x5f8   :  { %2232 = vset.pattern.permute.xlu1 %v2361_v16 }
 0x601   :  { %v2317_v13 = vpop.eup %2316 }
 0x602   :  { %1471 = vperm.xlu0 %2231, %v2317_v13   ;;  %v2363_v13 = vmov 7  }
 0x606   :  { %2233 = vset.pattern.permute.xlu0 %v2361_v16 }
 0x618   :  { %1171 = vadd.xlane.f32.xlu1 %v1170_v20 }
 0x627   :  { %v1096_v21 = vpop.xlane.xlu1 %1095 }
 0x628   :  { %2318 = vrcp.f32 %v1096_v21  ;;  %v1679_v21 = vmul.f32 0.33333334, %v3079_v11 }
 0x635   :  { %v2319_v24 = vpop.eup %2318 }
 0x636   :  { %v1098_v29 = vmul.f32 %v2319_v24, %v2315_v63 }
 0x638   :  { %1099 = vmax.xlane.f32.xlu0 %v1098_v29 }
 0x66f   :  { %v3120_v40 = vpop.permute.xlu1 %1481 }
 0x67d   :  { %v3114_v0 = vpop.permute.xlu0 %1471 }
 0x67e   :  { %v1474_v2 = vmul.f32 %v3114_v0, %v1458_v12 }
 0x680   :  { %v1487_v39 = vrot.slane %v1474_v2, %v1486_v35 }
 0x682   :  { %v1488_v43 = vmul.f32 %v1487_v39, %v3120_v40  ;;  %v1490_v47 = vmul.f32 %v3123_v42, %v1487_v39 }
 0x684   :  { %v1489_v46 = vsub.f32 %v1458_v12, %v1488_v43 }
 0x686   :  { %v1491_v52 = vadd.f32 %v1490_v47, %v1489_v46 }
 0x688   :  { %1514 = vperm.xlu1 %2232, %v1491_v52   ;;  %2320 = vrcp.f32 %v1491_v52 }
 0x68c   :  { %2234 = vset.pattern.permute.xlu1 %v2362_v54 }
 0x695   :  { %v2321_v53 = vpop.eup %2320 }
 0x696   :  { %1504 = vperm.xlu0 %2233, %v2321_v53  }
 0x69a   :  { %2235 = vset.pattern.permute.xlu0 %v2362_v54 }
 0x6a1   :  { %v1172_v55 = vpop.xlane.xlu1 %1171 }
 0x6a2   :  { %v1173_v3 = vadd.f32 1e-12, %v1172_v55 }
 0x6a4   :  { %2322 = vrsqrt.f32 %v1173_v3 }
 0x6b1   :  { %v2323_v6 = vpop.eup %2322 }
 0x6b2   :  { %v1175_v10 = vmul.f32 %v2323_v6, %v2885_v50 }
 0x6b4   :  { %2208 = vmatmul.mubr.f32.vlgmr.msra.gmra.mxu0 %v1175_v10 }
 0x6c1   :  { %v3128_v18 = vpop.xlane.xlu0 %1099 }
 0x6c2   :  { %vm1101_vm8 = vcmp.eq.f32.partialorder %v1098_v29, %v3128_v18  ;;  %vm1135_vm15 = vcmp.ge.f32.partialorder %v3128_v18, 0.97 }
 0x6c3   :  { %v1102_v19 = vsel %vm1101_vm8, %v3034_v1, 128 }
 0x6c4   :  { %v1104_v26 = vshra.s32 %v1102_v19, 16  ;;  %v1103_v38 = vand.u32 65535, %v1102_v19  ;;  %v1836_v19 = vsel %vm1542_vm12, 1.0, %v2354_v57 }
 0x6c6   :  { %v1106_v27 = vcvt.s32.f32 %v1104_v26  ;;  %v1105_v8 = vcvt.s32.f32 %v1103_v38 }
 0x6c8   :  { %1107 = vmin.xlane.f32.xlu1 %v1106_v27 }
 0x703   :  { %v3139_v59 = vpop.permute.xlu1 %1514 }
 0x711   :  { %v3133_v34 = vpop.permute.xlu0 %1504 }
 0x712   :  { %v1507_v58 = vmul.f32 %v3133_v34, %v1491_v52 }
 0x714   :  { %v1520_v50 = vrot.slane %v1507_v58, %v1519_v30 }
 0x716   :  { %v1521_v61 = vmul.f32 %v1520_v50, %v3139_v59  ;;  %v1523_v63 = vmul.f32 %v3142_v60, %v1520_v50 }
 0x718   :  { %v1522_v62 = vsub.f32 %v1491_v52, %v1521_v61  ;;  %v1552_v52 = vsub.s32 6, %v3032_v17 }
 0x71a   :  { %v1524_v33 = vadd.f32 %v1523_v63, %v1522_v62 }
 0x71c   :  { %1547 = vperm.xlu1 %2234, %v1524_v33   ;;  %2324 = vrcp.f32 %v1524_v33 }
 0x720   :  { %2237 = vset.pattern.permute.xlu1 %v2363_v13 }
 0x729   :  { %v2325_v12 = vpop.eup %2324 }
 0x751   :  { %v1108_v5 = vpop.xlane.xlu1 %1107 }
 0x752   :  { %vm1109_vm10 = vcmp.eq.f32.partialorder %v1106_v27, %v1108_v5  ;;  %v1114_v24 = vcvt.f32.s32 %v1108_v5 }
 0x753   :  { %v1110_v9 = vsel %vm1109_vm10, %v1105_v8, inf }
 0x754   :  { %1111 = vmin.xlane.f32.xlu0 %v1110_v9  ;;  %v1115_v2 = vshll.u32 %v1114_v24, 16 }
 0x76a   :  { %1537 = vperm.xlu0 %2235, %v2325_v12  }
 0x76e   :  { %2236 = vset.pattern.permute.xlu0 %v2363_v13 }
 0x774   :  { %v3146_v16 = vpop.f32.mrf.mxu0 }
 0x776   :  { %v2209_v20 = vpop.f32.mrf.mxu0 }
 0x789   :  { %1680 = vmax.xlane.f32.xlu0 %v1679_v21 }
 0x797   :  { %v1548_v6 = vpop.permute.xlu1 %1547 }
 0x7dd   :  { %v1112_v29 = vpop.xlane.xlu0 %1111 }
 0x7de   :  { %v1113_v39 = vcvt.f32.s32 %v1112_v29 }
 0x7e0   :  { %v1116_v43 = vadd.s32 %v1115_v2, %v1113_v39 }
 0x7e2   :  { %vm1117_vm11 = vcmp.eq.s32.totalorder %v3034_v1, %v1116_v43 }
 0x7e3   :  { %v3151_v46 = vsel %vm1117_vm11, 1.0, %v2354_v57 }
 0x7e4   :  { %v1829_v47 = vadd.f32 -0.5, %v3151_v46 }
 0x7e5   :  { %v1538_v53 = vpop.permute.xlu0 %1537 }
 0x7e6   :  { %v1334_v54 = vsel %vm1088_vm4, %v1829_v47, 0.0  ;;  %v1540_v11 = vmul.f32 %v1538_v53, %v1524_v33 }
 0x7e7   :  { %v1343_v55 = vmul.f32 %v3042_v28, %v1334_v54 }
 0x7e8   :  { %v1553_v3 = vrot.slane %v1540_v11, %v1552_v52 }
 0x7e9   :  { %v1363_v10 = vrot.slane %v1343_v55, %v1354_v25 }
 0x7ea   :  { %v1554_v26 = vmul.f32 %v1553_v3, %v1548_v6  ;;  %v1556_v58 = vmul.f32 %v1836_v19, %v1553_v3 }
 0x7eb   :  { %v1364_v27 = vmul.f32 %v1363_v10, %v3048_v36  ;;  %v1366_v62 = vmul.f32 %v3051_v37, %v1363_v10 }
 0x7ec   :  { %v1555_v50 = vsub.f32 %v1524_v33, %v1554_v26 }
 0x7ed   :  { %v1365_v61 = vsub.f32 %v1334_v54, %v1364_v27 }
 0x7ee   :  { %v1557_v63 = vadd.f32 %v1556_v58, %v1555_v50  ;;  %v1584_v50 = vsub.s32 7, %v3032_v17 }
 0x7ef   :  { %v1367_v38 = vadd.f32 %v1366_v62, %v1365_v61  ;;  %v1837_v62 = vsel %vm1574_vm13, 1.0, %v2354_v57 }
 0x7f0   :  { %1579 = vperm.xlu0 %2236, %v1557_v63   ;;  %2326 = vrcp.f32 %v1557_v63 }
 0x7f1   :  { %v1376_v28 = vmul.f32 %v3056_v45, %v1367_v38 }
 0x7f3   :  { %v1396_v5 = vrot.slane %v1376_v28, %v1387_v44 }
 0x7f5   :  { %v1397_v25 = vmul.f32 %v1396_v5, %v3065_v51  ;;  %v1399_v9 = vmul.f32 %v3063_v49, %v1396_v5 }
 0x7f7   :  { %v1398_v8 = vsub.f32 %v1367_v38, %v1397_v25 }
 0x7f9   :  { %v1400_v36 = vadd.f32 %v1399_v9, %v1398_v8  ;;  %v1083_v9 = vadd.f32 %v3072_v7, %v3038_v4 }
 0x7fb   :  { %v1409_v33 = vmul.f32 %v3083_v15, %v1400_v36  ;;  %v3180_v15 = vadd.f32 %v3072_v7, %v2962_v41 }
 0x7fd   :  { %v2327_v12 = vpop.eup %2326  ;;  %v1429_v37 = vrot.slane %v1409_v33, %v1420_v14 }
 0x7fe   :  { %1570 = vperm.xlu1 %2237, %v2327_v12  }
 0x7ff   :  { %v1430_v13 = vmul.f32 %v1429_v37, %v3092_v23  ;;  %v1432_v45 = vmul.f32 %v3090_v22, %v1429_v37  ;;  %v3186_v22 = vsel %vm1088_vm4, %v3180_v15, -1e+30 }
 0x801   :  { %v1431_v20 = vsub.f32 %v1400_v36, %v1430_v13  ;;  %v1120_v36 = vsel %vm1088_vm4, %v1083_v9, -1e+30 }
 0x803   :  { %v1433_v24 = vadd.f32 %v1432_v45, %v1431_v20 }
 0x805   :  { %v1442_v44 = vmul.f32 %v3098_v32, %v1433_v24 }
 0x807   :  { %v1462_v51 = vrot.slane %v1442_v44, %v1453_v31 }
 0x809   :  { %v1463_v49 = vmul.f32 %v1462_v51, %v3107_v56  ;;  %v1465_v14 = vmul.f32 %v3105_v48, %v1462_v51 }
 0x80b   :  { %v1464_v29 = vsub.f32 %v1433_v24, %v1463_v49 }
 0x80d   :  { %v1466_v2 = vadd.f32 %v1465_v14, %v1464_v29 }
 0x80f   :  { %v1475_v23 = vmul.f32 %v3114_v0, %v1466_v2  ;;  %1149 = vmax.xlane.f32.xlu0 %v3186_v22 }
 0x811   :  { %v1495_v31 = vrot.slane %v1475_v23, %v1486_v35 }
 0x812   :  { %v1681_v32 = vpop.xlane.xlu0 %1680 }
 0x813   :  { %v1496_v41 = vmul.f32 %v1495_v31, %v3120_v40  ;;  %v1682_v56 = vsub.f32 %v1679_v21, %v1681_v32  ;;  %v1498_v48 = vmul.f32 %v3123_v42, %v1495_v31 }
 0x815   :  { %v1497_v39 = vsub.f32 %v1466_v2, %v1496_v41  ;;  %v1683_v43 = vmul.f32 1.442695, %v1682_v56 }
 0x817   :  { %v1499_v47 = vadd.f32 %v1498_v48, %v1497_v39  ;;  %2328 = vpow2.f32 %v1683_v43 }
 0x819   :  { %v1508_v54 = vmul.f32 %v3133_v34, %v1499_v47 }
 0x81b   :  { %v1528_v0 = vrot.slane %v1508_v54, %v1519_v30 }
 0x81d   :  { %v1529_v11 = vmul.f32 %v1528_v0, %v3139_v59  ;;  %v1531_v35 = vmul.f32 %v3142_v60, %v1528_v0 }
 0x81f   :  { %v1530_v55 = vsub.f32 %v1499_v47, %v1529_v11 }
 0x821   :  { %v1532_v3 = vadd.f32 %v1531_v35, %v1530_v55 }
 0x823   :  { %v1541_v10 = vmul.f32 %v1538_v53, %v1532_v3 }
 0x824   :  { %v2329_v40 = vpop.eup %2328 }
 0x825   :  { %v1561_v21 = vrot.slane %v1541_v10, %v1552_v52  ;;  %1685 = vadd.xlane.f32.xlu1 %v2329_v40  ;;  %v1827_v52 = vclamps-f32 %v3146_v16, 1.0 }
 0x827   :  { %v1562_v26 = vmul.f32 %v1561_v21, %v1548_v6  ;;  %v1564_v42 = vmul.f32 %v1836_v19, %v1561_v21 }
 0x829   :  { %v1563_v27 = vsub.f32 %v1532_v3, %v1562_v26 }
 0x82b   :  { %v1565_v58 = vadd.f32 %v1564_v42, %v1563_v27 }
 0x86b   :  { %v1580_v59 = vpop.permute.xlu0 %1579 }
 0x879   :  { %v1571_v34 = vpop.permute.xlu1 %1570 }
 0x87a   :  { %v1573_v30 = vmul.f32 %v1571_v34, %v1565_v58 }
 0x87c   :  { %v1585_v61 = vrot.slane %v1573_v30, %v1584_v50 }
 0x87e   :  { %v1586_v60 = vmul.f32 %v1585_v61, %v1580_v59  ;;  %v1588_v53 = vmul.f32 %v1837_v62, %v1585_v61  ;;  %v1147_v61 = vld [vmem:[%s3239_s7] sm:$0xff] }
 0x87f   :  { %v1839_v59 = vadd.f32 -0.5, %v1147_v61 }
 0x880   :  { %v1587_v63 = vsub.f32 %v1565_v58, %v1586_v60  ;;  %v1131_v60 = vmul.f32 %v3151_v46, %v1083_v9 }
 0x882   :  { %v1589_v38 = vadd.f32 %v1588_v53, %v1587_v63  ;;  %v1665_v63 = vsel %vm1088_vm4, %v1839_v59, 0.0 }
 0x884   :  { %2211 = vmatpush3.msra.mxu1 %v1589_v38  ;;  %v1159_v38 = vmul.f32 %v1147_v61, %v3180_v15 }
 0x885   :  { %2213 = vmatmul.mubr.msk.f32.vlgmr.msra.gmra.mxu1 %vm1590_vm14, %v1827_v52 }
 0x898   :  { %v3207_v13 = vpop.xlane.xlu0 %1149 }
 0x899   :  { %v1151_v24 = vsub.f32 %v3186_v22, %v3207_v13 }
 0x89b   :  { %v1152_v51 = vmul.f32 1.442695, %v1151_v24 }
 0x8ae   :  { %v1686_v6 = vpop.xlane.xlu1 %1685 }
 0x8af   :  { %2330 = vrcp.f32 %v1686_v6 }
 0x8bc   :  { %v2331_v19 = vpop.eup %2330 }
 0x8bd   :  { %v1688_v28 = vmul.f32 %v2331_v19, %v2329_v40 }
 0x8bf   :  { %v1689_v5 = vadd.f32 1e-05, %v1688_v28  ;;  %v1720_v22 = vadd.f32 1e-12, %v1688_v28 }
 0x8c1   :  { %2332 = vlog2.f32 %v1689_v5 }
 0x8ce   :  { %v2333_v17 = vpop.eup %2332 }
 0x8cf   :  { %v1691_v25 = vmul.f32 0.6931472, %v2333_v17 }
 0x8d1   :  { %v1692_v8 = vmul.f32 %v1691_v25, %v1688_v28 }
 0x8d3   :  { %1693 = vadd.xlane.f32.xlu1 %v1692_v8 }
 0x8d7   :  { %1121 = vmax.xlane.f32.xlu1 %v1120_v36 }
 0x945   :  { %v1660_v16 = vpop.f32.mrf.mxu1 }
 0x946   :  { %v1666_v53 = vsub.f32 %v1660_v16, %v1665_v63 }
 0x947   :  { %v2214_v33 = vpop.f32.mrf.mxu1 }
 0x948   :  { %v1667_v52 = vmul.f32 %v1666_v53, %v1666_v53 }
 0x95c   :  { %v1694_v12 = vpop.xlane.xlu1 %1693 }
 0x95d   :  { %v1695_v37 = vsub.f32 0.0, %v1694_v12 }
 0x95f   :  { %v1696_v20 = vsub.f32 0.0, %v1695_v37 }
 0x960   :  { %v3209_v45 = vpop.xlane.xlu1 %1121 }
 0x961   :  { %v1697_v44 = vmul.f32 1.442695, %v1696_v20  ;;  %v1123_v4 = vsub.f32 %v1120_v36, %v3209_v45  ;;  %v1825_v20 = vsel %vm1135_vm15, 1.0, %v2354_v57 }
 0x963   :  { %2334 = vpow2.f32 %v1697_v44  ;;  %v1124_v7 = vmul.f32 1.442695, %v1123_v4 }
 0x965   :  { %2336 = vpow2.f32 %v1124_v7 }
 0x966   :  { %2338 = vpow2.f32 %v1152_v51 }
 0x970   :  { %v2335_v49 = vpop.eup %2334 }
 0x971   :  { %v1699_v29 = vadd.f32 1.0, %v2335_v49 }
 0x972   :  { %v2337_v14 = vpop.eup %2336 }
 0x973   :  { %v1701_v2 = vrot.slane %v1699_v29, 4  ;;  %1126 = vadd.xlane.f32.xlu1 %v2337_v14  ;;  %v2339_v31 = vpop.eup %2338  ;;  %v1700_v48 = vmul.f32 8.0, %v1699_v29 }
 0x975   :  { %v1702_v23 = vadd.f32 %v1701_v2, %v1699_v29 }
 0x977   :  { %v1703_v32 = vrot.slane %v1702_v23, 2  ;;  %1154 = vadd.xlane.f32.xlu1 %v2339_v31 }
 0x979   :  { %v1704_v41 = vadd.f32 %v1703_v32, %v1702_v23 }
 0x97b   :  { %v1705_v56 = vrot.slane %v1704_v41, 1 }
 0x97d   :  { %v1706_v39 = vadd.f32 %v1705_v56, %v1704_v41 }
 0x97f   :  { %2340 = vrcp.f32 %v1706_v39 }
 0x980   :  { %2342 = vlog2.f32 %v1720_v22 }
 0x98c   :  { %v2341_v43 = vpop.eup %2340 }
 0x98d   :  { %v1708_v47 = vmul.f32 %v2341_v43, %v1700_v48  ;;  %v2343_v54 = vpop.eup %2342 }
 0x98e   :  { %v1722_v55 = vmul.f32 0.6931472, %v2343_v54 }
 0x98f   :  { %v1709_v0 = vmul.f32 %v1708_v47, %v1688_v28 }
 0x990   :  { %v1723_v10 = vmul.f32 1.9, %v1722_v55 }
 0x991   :  { %v1710_v11 = vrot.slane %v1709_v0, 4 }
 0x992   :  { %v1724_v26 = vmul.f32 1.442695, %v1723_v10 }
 0x993   :  { %v1711_v35 = vadd.f32 %v1710_v11, %v1709_v0 }
 0x994   :  { %2344 = vpow2.f32 %v1724_v26 }
 0x995   :  { %v1712_v3 = vrot.slane %v1711_v35, 2 }
 0x997   :  { %v1713_v40 = vadd.f32 %v1712_v3, %v1711_v35 }
 0x999   :  { %v1714_v21 = vrot.slane %v1713_v40, 1 }
 0x99b   :  { %v1715_v42 = vadd.f32 %v1714_v21, %v1713_v40 }
 0x99d   :  { %v1726_v27 = vsel %vm1088_vm4, %v1715_v42, 1.0  ;;  %1716 = vadd.xlane.f32.xlu1 %v1715_v42 }
 0x99e   :  { %2346 = vrcp.f32 %v1726_v27 }
 0x9a1   :  { %v2345_v58 = vpop.eup %2344 }
 0x9ab   :  { %v2347_v50 = vpop.eup %2346 }
 0x9ac   :  { %v1728_v34 = vmul.f32 %v2347_v50, %v2345_v58 }
 0x9ae   :  { %v1729_v30 = vmul.f32 %v1728_v34, %v1708_v47 }
 0x9b0   :  { %v1730_v62 = vsel %vm1088_vm4, %v1729_v30, 0.0 }
 0x9b1   :  { %1731 = vadd.xlane.f32.xlu1 %v1730_v62 }
 0x9b5   :  { %1132 = vadd.xlane.f32.xlu1 %v1131_v60 }
 0x9b9   :  { %1160 = vadd.xlane.f32.xlu1 %v1159_v38 }
 0x9bd   :  { %1668 = vadd.xlane.f32.xlu1 %v1667_v52 }
 0x9fc   :  { %v1127_v6 = vpop.xlane.xlu1 %1126 }
 0x9fd   :  { %2348 = vlog2.f32 %v1127_v6 }
 0xa00   :  { %v1155_v19 = vpop.xlane.xlu1 %1154 }
 0xa01   :  { %2350 = vlog2.f32 %v1155_v19 }
 0xa0a   :  { %v2349_v17 = vpop.eup %2348 }
 0xa0b   :  { %v1129_v46 = vmul.f32 0.6931472, %v2349_v17 }
 0xa0d   :  { %v1130_v16 = vadd.f32 %v1129_v46, %v3209_v45 }
 0xa0e   :  { %v2351_v25 = vpop.eup %2350 }
 0xa0f   :  { %v1157_v36 = vmul.f32 0.6931472, %v2351_v25 }
 0xa11   :  { %v1158_v4 = vadd.f32 %v1157_v36, %v3207_v13 }
 0xa26   :  { %v1717_v28 = vpop.xlane.xlu1 %1716 }
 0xa27   :  { %v1719_v5 = vmul.f32 0.5, %v1717_v28 }
 0xa29   :  { %2352 = vrcp.f32 %v1719_v5 }
 0xa36   :  { %v2353_v8 = vpop.eup %2352 }
 0xa3a   :  { %v1732_v1 = vpop.xlane.xlu1 %1731 }
 0xa3b   :  { %v1735_v9 = vsub.f32 %v2353_v8, %v1732_v1 }
 0xa3d   :  { %v1736_v15 = vrot.slane %v1735_v9, 4 }
 0xa3e   :  { %v1133_v33 = vpop.xlane.xlu1 %1132 }
 0xa3f   :  { %v1737_v12 = vadd.f32 %v1736_v15, %v1735_v9  ;;  %v1134_v37 = vsub.f32 %v1130_v16, %v1133_v33 }
 0xa41   :  { %v1738_v24 = vrot.slane %v1737_v12, 2  ;;  %v1138_v44 = vmul.f32 %v1825_v20, %v1134_v37 }
 0xa42   :  { %v1161_v7 = vpop.xlane.xlu1 %1160 }
 0xa43   :  { %v1739_v51 = vadd.f32 %v1738_v24, %v1737_v12  ;;  %v1139_v49 = vrot.slane %v1138_v44, 4  ;;  %v1162_v29 = vsub.f32 %v1158_v4, %v1161_v7 }
 0xa45   :  { %v1140_v14 = vadd.f32 %v1139_v49, %v1138_v44  ;;  %v1163_v2 = vrot.slane %v1162_v29, 4  ;;  %v1740_v23 = vrot.slane %v1739_v51, 1 }
 0xa46   :  { %v1669_v18 = vpop.xlane.xlu1 %1668 }
 0xa47   :  { %v1141_v31 = vrot.slane %v1140_v14, 2  ;;  %v1164_v32 = vadd.f32 %v1163_v2, %v1162_v29  ;;  %v1670_v45 = vrot.slane %v1669_v18, 4  ;;  %v1741_v39 = vadd.f32 %v1740_v23, %v1739_v51 }
 0xa49   :  { %v1142_v41 = vadd.f32 %v1141_v31, %v1140_v14  ;;  %v1165_v56 = vrot.slane %v1164_v32, 2  ;;  %v1671_v22 = vadd.f32 %v1670_v45, %v1669_v18  ;;  %v1742_v54 = vmul.f32 1.1111112, %v1741_v39 }
 0xa4b   :  { %v1143_v57 = vrot.slane %v1142_v41, 1  ;;  %v1166_v48 = vadd.f32 %v1165_v56, %v1164_v32  ;;  %v1672_v43 = vrot.slane %v1671_v22, 2  ;;  %v1743_v10 = vmul.f32 0.08, %v1742_v54 }
 0xa4d   :  { %v1167_v47 = vrot.slane %v1166_v48, 1  ;;  %v1673_v13 = vadd.f32 %v1672_v43, %v1671_v22  ;;  %v1144_v0 = vadd.f32 %v1143_v57, %v1142_v41 }
 0xa4f   :  { %v1168_v11 = vadd.f32 %v1167_v47, %v1166_v48  ;;  %v1674_v55 = vrot.slane %v1673_v13, 1  ;;  %v1146_v40 = vmul.f32 0.125, %v1144_v0 }
 0xa51   :  { %v1169_v35 = vmul.f32 0.125, %v1168_v11  ;;  %v1675_v3 = vadd.f32 %v1674_v55, %v1673_v13  ;;  %v1748_v27 = vmul.f32 0.5, %v1146_v40  ;;  %vm1747_vm0 = vcmp.ne.f32.partialorder %v1146_v40, 0.0 }
 0xa53   :  { %v1677_v21 = vmul.f32 0.0625, %v1675_v3  ;;  %v1744_v26 = vadd.f32 %v1743_v10, %v1169_v35 }
 0xa55   :  { %v1745_v42 = vmul.f32 2.0, %v1677_v21 }
 0xa57   :  { %v1746_v58 = vadd.f32 %v1745_v42, %v1744_v26 }
 0xa59   :  { %v1749_v50 = vadd.f32 %v1748_v27, %v1746_v58 }
 0xa5b   :  { %v1750_v34 = vsel %vm1747_vm0, %v1749_v50, %v1746_v58 }
 0xa5c   :  { %1751 = vst [vmem:[%s3240_s8] sm:$0xff] %v1750_v34 }

</bundles_post_ra>
